<compile_context>
chip_gen: v7x
topology: tpu7x:2x2x1
jax: 0.10.0
libtpu: 0.0.40
codegen_flags: <defaults>
</compile_context>

<pallas_src>
import jax
import jax.numpy as jnp
from jax.experimental import pallas as pl
from jax.experimental.pallas import tpu as pltpu

LN_EPS = 1e-5


def ffn_ln_kernel(x_ref, w1_ref, b1_ref, w2_ref, b2_ref, gamma_ref, beta_ref,
                  o_ref, acc_ref):
    """Grid = (rows, d_inner chunks). acc_ref: (tm, D) f32 accumulator scratch."""
    kc = pl.program_id(1)

    @pl.when(kc == 0)
    def _():
        acc_ref[...] = jnp.zeros_like(acc_ref)

    x = x_ref[...]

    # h_chunk = relu(x @ W1[:, kc] + b1[kc])      (MXU, f32 accumulation)
    h = jnp.dot(x.astype(w1_ref.dtype), w1_ref[...],
                preferred_element_type=jnp.float32)
    h = jnp.maximum(h + b1_ref[...], 0.0)

    # acc += h_chunk @ W2[kc, :]                  (MXU, f32 accumulation)
    acc_ref[...] += jnp.dot(h.astype(w2_ref.dtype), w2_ref[...],
                            preferred_element_type=jnp.float32)

    @pl.when(kc == pl.num_programs(1) - 1)
    def _():
        # bias + residual (dropout == identity in eval mode)
        y = acc_ref[...] + b2_ref[...] + x.astype(jnp.float32)

        # Fused single-pass LayerNorm statistics (biased variance, eps=1e-5)
        inv_d = 1.0 / y.shape[-1]
        s1 = jnp.sum(y, axis=-1, keepdims=True)
        s2 = jnp.sum(y * y, axis=-1, keepdims=True)
        mean = s1 * inv_d
        var = s2 * inv_d - mean * mean
        y_norm = (y - mean) * jax.lax.rsqrt(var + LN_EPS)
        o_ref[...] = (y_norm * gamma_ref[...] + beta_ref[...]).astype(o_ref.dtype)


def encoder_ffn(enc_input, params, *, tm=256, tk=512, matmul_dtype=None,
                vmem_limit_bytes=48 * 1024 * 1024):
    """enc_input: [B, S, D] float32.  params: dict of w1,b1,w2,b2,gamma,beta.

    tm: row tile (multiple of 8, ideally of 128).  tk: d_inner chunk (multiple of 128).
    matmul_dtype: e.g. jnp.bfloat16 to run matmul operands in bf16 (f32 accumulation).
    """
    B, S, D = enc_input.shape
    d_inner = params["w1"].shape[1]
    M = B * S

    # Clamp tiles to problem size, then validate alignment.
    tm = min(tm, M)
    tk = min(tk, d_inner)
    assert M % tm == 0, "row count must be divisible by the row tile"
    assert tm % 8 == 0, "row tile must be a multiple of 8 (sublane)"
    assert d_inner % tk == 0, "d_inner must be divisible by the inner tile"
    assert tk % 128 == 0, "inner tile must be a multiple of 128 (lane)"
    assert D % 128 == 0, "d_model must be a multiple of 128 for lane-dense stores"

    x2d = enc_input.reshape(M, D)

    w1, w2 = params["w1"], params["w2"]
    if matmul_dtype is not None:
        # Cast weights once on the host side: halves weight DMA bytes and VMEM.
        w1 = w1.astype(matmul_dtype)
        w2 = w2.astype(matmul_dtype)

    # Biases / LN params presented as (1, N) so they broadcast over the row tile (kept f32).
    b1 = params["b1"].reshape(1, d_inner).astype(jnp.float32)
    b2 = params["b2"].reshape(1, D).astype(jnp.float32)
    gamma = params["gamma"].reshape(1, D).astype(jnp.float32)
    beta = params["beta"].reshape(1, D).astype(jnp.float32)

    n_rows = M // tm
    n_k = d_inner // tk

    # Advisory cost estimate for XLA scheduling around the custom call.
    itemsize_w = jnp.dtype(w1.dtype).itemsize
    cost = pl.CostEstimate(
        flops=int(4 * M * D * d_inner),
        transcendentals=int(M),  # one rsqrt per row
        bytes_accessed=int(
            M * D * 4                                   # x
            + M * D * enc_input.dtype.itemsize          # out
            + n_rows * 2 * D * d_inner * itemsize_w     # W1 + W2 streamed per row step
            + (d_inner + 3 * D) * 4                     # biases + LN params
        ),
    )

    out2d = pl.pallas_call(
        ffn_ln_kernel,
        out_shape=jax.ShapeDtypeStruct((M, D), enc_input.dtype),
        grid_spec=pltpu.PrefetchScalarGridSpec(
            num_scalar_prefetch=0,
            grid=(n_rows, n_k),
            in_specs=[
                pl.BlockSpec((tm, D), lambda i, k: (i, 0)),      # x tile (resident across k)
                pl.BlockSpec((D, tk), lambda i, k: (0, k)),      # W1 chunk (streamed)
                pl.BlockSpec((1, tk), lambda i, k: (0, k)),      # b1 chunk
                pl.BlockSpec((tk, D), lambda i, k: (k, 0)),      # W2 chunk (streamed)
                pl.BlockSpec((1, D), lambda i, k: (0, 0)),       # b2
                pl.BlockSpec((1, D), lambda i, k: (0, 0)),       # gamma
                pl.BlockSpec((1, D), lambda i, k: (0, 0)),       # beta
            ],
            out_specs=pl.BlockSpec((tm, D), lambda i, k: (i, 0)),
            scratch_shapes=[pltpu.VMEM((tm, D), jnp.float32)],   # f32 accumulator
        ),
        compiler_params=pltpu.CompilerParams(
            dimension_semantics=("parallel", "arbitrary"),
            vmem_limit_bytes=vmem_limit_bytes,
        ),
        cost_estimate=cost,
    )(x2d, w1, b1, w2, b2, gamma, beta)

    return out2d.reshape(B, S, D)


def init_params(key, d_model, d_inner):
    k1, k2, k3, k4 = jax.random.split(key, 4)
    s1 = 1.0 / jnp.sqrt(d_model)
    s2 = 1.0 / jnp.sqrt(d_inner)
    return {
        # Stored as (in, out) so kernel does x @ W  (== x @ W_pt.T in PyTorch)
        "w1": jax.random.uniform(k1, (d_model, d_inner), jnp.float32, -s1, s1),
        "b1": jax.random.uniform(k2, (d_inner,), jnp.float32, -s1, s1),
        "w2": jax.random.uniform(k3, (d_inner, d_model), jnp.float32, -s2, s2),
        "b2": jax.random.uniform(k4, (d_model,), jnp.float32, -s2, s2),
        "gamma": jnp.ones((d_model,), jnp.float32),
        "beta": jnp.zeros((d_model,), jnp.float32),
    }


def reference(enc_input, params):
    # Pure-JAX reference (eval mode).
    x = enc_input
    h = jnp.maximum(x @ params["w1"] + params["b1"], 0.0)
    out = h @ params["w2"] + params["b2"]
    y = out + x
    mean = jnp.mean(y, axis=-1, keepdims=True)
    var = jnp.mean((y - mean) ** 2, axis=-1, keepdims=True)
    y_norm = (y - mean) / jnp.sqrt(var + LN_EPS)
    return y_norm * params["gamma"] + params["beta"]


if __name__ == "__main__":
    # Small but TPU-friendly shapes: M = B*S = 256 rows -> 2 row steps (both TCs get work),
    # d_inner = 512 with tk = 256 -> 2 reduction steps (exercises the accumulator path).
    B, S, D_MODEL, D_INNER = 2, 128, 256, 512
    TM, TK = 128, 256

    key = jax.random.PRNGKey(0)
    k_params, k_x = jax.random.split(key)
    params = init_params(k_params, D_MODEL, D_INNER)
    enc_input = jax.random.normal(k_x, (B, S, D_MODEL), jnp.float32)

    ref = reference(enc_input, params)

    # f32 path: tight tolerance against the reference.
    out_f32 = jax.block_until_ready(encoder_ffn(enc_input, params, tm=TM, tk=TK))
    assert out_f32.shape == (B, S, D_MODEL)
    assert jnp.allclose(out_f32, ref, atol=1e-4, rtol=1e-4), "f32 mismatch vs reference"

    # bf16 matmul-operand path (f32 accumulation, f32 residual/LayerNorm): loose tolerance.
    out_bf16 = jax.block_until_ready(
        encoder_ffn(enc_input, params, tm=TM, tk=TK, matmul_dtype=jnp.bfloat16))
    assert out_bf16.shape == (B, S, D_MODEL)
    assert jnp.allclose(out_bf16, ref, atol=1e-1, rtol=1e-1), "bf16 mismatch vs reference"

    print("KERNEL_OK")
</pallas_src>

<mosaic_0001>
module attributes {stable_mosaic.version = 11 : i64} {
  func.func @ffn_ln_kernel(%arg0: i32, %arg1: i32, %arg2: memref<128x256xf32, #tpu.memory_space<vmem>>, %arg3: memref<256x256xf32, #tpu.memory_space<vmem>>, %arg4: memref<1x256xf32, #tpu.memory_space<vmem>>, %arg5: memref<256x256xf32, #tpu.memory_space<vmem>>, %arg6: memref<1x256xf32, #tpu.memory_space<vmem>>, %arg7: memref<1x256xf32, #tpu.memory_space<vmem>>, %arg8: memref<1x256xf32, #tpu.memory_space<vmem>>, %arg9: memref<128x256xf32, #tpu.memory_space<vmem>>, %arg10: memref<128x256xf32, #tpu.memory_space<vmem>>) attributes {dimension_semantics = [#tpu.dimension_semantics<parallel>, #tpu.dimension_semantics<arbitrary>], iteration_bounds = array<i64: 2, 2>, scalar_prefetch = 0 : i64, scratch_operands = 1 : i64, tpu.core_type = #tpu.core_type<tc>, window_params = [{transform_indices = @transform_0, window_bounds = array<i64: 128, 256>}, {transform_indices = @transform_1, window_bounds = array<i64: 256, 256>}, {transform_indices = @transform_2, window_bounds = array<i64: 1, 256>}, {transform_indices = @transform_3, window_bounds = array<i64: 256, 256>}, {pipeline_mode = #tpu.pipeline_mode<synchronous>, transform_indices = @transform_4, window_bounds = array<i64: 1, 256>}, {pipeline_mode = #tpu.pipeline_mode<synchronous>, transform_indices = @transform_5, window_bounds = array<i64: 1, 256>}, {pipeline_mode = #tpu.pipeline_mode<synchronous>, transform_indices = @transform_6, window_bounds = array<i64: 1, 256>}, {transform_indices = @transform_7, window_bounds = array<i64: 128, 256>}]} {
    %c0_i32 = arith.constant 0 : i32
    %0 = arith.cmpi eq, %arg1, %c0_i32 : i32
    %1 = arith.extui %0 : i1 to i32
    %c0_i32_0 = arith.constant 0 : i32
    %2 = arith.cmpi ne, %1, %c0_i32_0 : i32
    scf.if %2 {
      %cst_15 = arith.constant 0.000000e+00 : f32
      %19 = vector.broadcast %cst_15 : f32 to vector<128x256xf32>
      %c0_16 = arith.constant 0 : index
      %c0_17 = arith.constant 0 : index
      %20 = vector.load %arg10[%c0_16, %c0_17] : memref<128x256xf32, #tpu.memory_space<vmem>>, vector<128x256xf32>
      tpu.vector_store %arg10[%c0_16, %c0_17], %19 {strides = array<i32>} : memref<128x256xf32, #tpu.memory_space<vmem>>, vector<128x256xf32>,
    } else {
    }
    %c0 = arith.constant 0 : index
    %c0_1 = arith.constant 0 : index
    %3 = vector.load %arg2[%c0, %c0_1] : memref<128x256xf32, #tpu.memory_space<vmem>>, vector<128x256xf32>
    %c0_2 = arith.constant 0 : index
    %c0_3 = arith.constant 0 : index
    %4 = vector.load %arg3[%c0_2, %c0_3] : memref<256x256xf32, #tpu.memory_space<vmem>>, vector<256x256xf32>
    %cst = arith.constant dense<0.000000e+00> : vector<128x256xf32>
    %5 = tpu.matmul %3, %4, %cst {dimension_numbers = #tpu.dot_dimension_numbers<[1], [0], [0], [1], [0, 0, 1, 1], [], []>} : vector<128x256xf32>, vector<256x256xf32>, vector<128x256xf32> -> vector<128x256xf32>
    %c0_4 = arith.constant 0 : index
    %c0_5 = arith.constant 0 : index
    %6 = vector.load %arg4[%c0_4, %c0_5] : memref<1x256xf32, #tpu.memory_space<vmem>>, vector<1x256xf32>
    %7 = vector.broadcast %6 : vector<1x256xf32> to vector<128x256xf32>
    %8 = arith.addf %5, %7 : vector<128x256xf32>
    %cst_6 = arith.constant 0.000000e+00 : f32
    %9 = vector.broadcast %cst_6 : f32 to vector<128x256xf32>
    %10 = arith.maximumf %8, %9 : vector<128x256xf32>
    %c0_7 = arith.constant 0 : index
    %c0_8 = arith.constant 0 : index
    %11 = vector.load %arg10[%c0_7, %c0_8] : memref<128x256xf32, #tpu.memory_space<vmem>>, vector<128x256xf32>
    %c0_9 = arith.constant 0 : index
    %c0_10 = arith.constant 0 : index
    %12 = vector.load %arg5[%c0_9, %c0_10] : memref<256x256xf32, #tpu.memory_space<vmem>>, vector<256x256xf32>
    %cst_11 = arith.constant dense<0.000000e+00> : vector<128x256xf32>
    %13 = tpu.matmul %10, %12, %cst_11 {dimension_numbers = #tpu.dot_dimension_numbers<[1], [0], [0], [1], [0, 0, 1, 1], [], []>} : vector<128x256xf32>, vector<256x256xf32>, vector<128x256xf32> -> vector<128x256xf32>
    %14 = arith.addf %11, %13 : vector<128x256xf32>
    %c0_12 = arith.constant 0 : index
    %c0_13 = arith.constant 0 : index
    %15 = vector.load %arg10[%c0_12, %c0_13] : memref<128x256xf32, #tpu.memory_space<vmem>>, vector<128x256xf32>
    tpu.vector_store %arg10[%c0_12, %c0_13], %14 {strides = array<i32>} : memref<128x256xf32, #tpu.memory_space<vmem>>, vector<128x256xf32>,
    %c1_i32 = arith.constant 1 : i32
    %16 = arith.cmpi eq, %arg1, %c1_i32 : i32
    %17 = arith.extui %16 : i1 to i32
    %c0_i32_14 = arith.constant 0 : i32
    %18 = arith.cmpi ne, %17, %c0_i32_14 : i32
    scf.if %18 {
      %c0_15 = arith.constant 0 : index
      %c0_16 = arith.constant 0 : index
      %19 = vector.load %arg10[%c0_15, %c0_16] : memref<128x256xf32, #tpu.memory_space<vmem>>, vector<128x256xf32>
      %c0_17 = arith.constant 0 : index
      %c0_18 = arith.constant 0 : index
      %20 = vector.load %arg6[%c0_17, %c0_18] : memref<1x256xf32, #tpu.memory_space<vmem>>, vector<1x256xf32>
      %21 = vector.broadcast %20 : vector<1x256xf32> to vector<128x256xf32>
      %22 = arith.addf %19, %21 : vector<128x256xf32>
      %23 = arith.addf %22, %3 : vector<128x256xf32>
      %cst_19 = arith.constant dense<0.000000e+00> : vector<128xf32>
      %24 = vector.multi_reduction <add>, %23, %cst_19 [1] : vector<128x256xf32> to vector<128xf32>
      %25 = vector.shape_cast %24 : vector<128xf32> to vector<128x1xf32>
      %26 = arith.mulf %23, %23 : vector<128x256xf32>
      %cst_20 = arith.constant dense<0.000000e+00> : vector<128xf32>
      %27 = vector.multi_reduction <add>, %26, %cst_20 [1] : vector<128x256xf32> to vector<128xf32>
      %28 = vector.shape_cast %27 : vector<128xf32> to vector<128x1xf32>
      %cst_21 = arith.constant 3.906250e-03 : f32
      %29 = vector.broadcast %cst_21 : f32 to vector<128x1xf32>
      %30 = arith.mulf %25, %29 : vector<128x1xf32>
      %cst_22 = arith.constant 3.906250e-03 : f32
      %31 = vector.broadcast %cst_22 : f32 to vector<128x1xf32>
      %32 = arith.mulf %28, %31 : vector<128x1xf32>
      %33 = arith.mulf %30, %30 : vector<128x1xf32>
      %34 = arith.subf %32, %33 : vector<128x1xf32>
      %35 = vector.broadcast %30 : vector<128x1xf32> to vector<128x256xf32>
      %36 = arith.subf %23, %35 : vector<128x256xf32>
      %cst_23 = arith.constant 9.99999974E-6 : f32
      %37 = vector.broadcast %cst_23 : f32 to vector<128x1xf32>
      %38 = arith.addf %34, %37 : vector<128x1xf32>
      %39 = math.rsqrt %38 : vector<128x1xf32>
      %40 = vector.broadcast %39 : vector<128x1xf32> to vector<128x256xf32>
      %41 = arith.mulf %36, %40 : vector<128x256xf32>
      %c0_24 = arith.constant 0 : index
      %c0_25 = arith.constant 0 : index
      %42 = vector.load %arg7[%c0_24, %c0_25] : memref<1x256xf32, #tpu.memory_space<vmem>>, vector<1x256xf32>
      %43 = vector.broadcast %42 : vector<1x256xf32> to vector<128x256xf32>
      %44 = arith.mulf %41, %43 : vector<128x256xf32>
      %c0_26 = arith.constant 0 : index
      %c0_27 = arith.constant 0 : index
      %45 = vector.load %arg8[%c0_26, %c0_27] : memref<1x256xf32, #tpu.memory_space<vmem>>, vector<1x256xf32>
      %46 = vector.broadcast %45 : vector<1x256xf32> to vector<128x256xf32>
      %47 = arith.addf %44, %46 : vector<128x256xf32>
      %c0_28 = arith.constant 0 : index
      %c0_29 = arith.constant 0 : index
      %48 = vector.load %arg9[%c0_28, %c0_29] : memref<128x256xf32, #tpu.memory_space<vmem>>, vector<128x256xf32>
      tpu.vector_store %arg9[%c0_28, %c0_29], %47 {strides = array<i32>} : memref<128x256xf32, #tpu.memory_space<vmem>>, vector<128x256xf32>,
    } else {
    }
    return
  }
  func.func @transform_0(%arg0: i32, %arg1: i32) -> (i32, i32) {
    %c0_i32 = arith.constant 0 : i32
    %c0_i32_0 = arith.constant 0 : i32
    return %arg0, %c0_i32 : i32, i32
  }
  func.func @transform_1(%arg0: i32, %arg1: i32) -> (i32, i32) {
    %c0_i32 = arith.constant 0 : i32
    %c0_i32_0 = arith.constant 0 : i32
    return %c0_i32, %arg1 : i32, i32
  }
  func.func @transform_2(%arg0: i32, %arg1: i32) -> (i32, i32) {
    %c0_i32 = arith.constant 0 : i32
    %c0_i32_0 = arith.constant 0 : i32
    return %c0_i32, %arg1 : i32, i32
  }
  func.func @transform_3(%arg0: i32, %arg1: i32) -> (i32, i32) {
    %c0_i32 = arith.constant 0 : i32
    %c0_i32_0 = arith.constant 0 : i32
    return %arg1, %c0_i32 : i32, i32
  }
  func.func @transform_4(%arg0: i32, %arg1: i32) -> (i32, i32) {
    %c0_i32 = arith.constant 0 : i32
    %c0_i32_0 = arith.constant 0 : i32
    %c0_i32_1 = arith.constant 0 : i32
    return %c0_i32, %c0_i32_0 : i32, i32
  }
  func.func @transform_5(%arg0: i32, %arg1: i32) -> (i32, i32) {
    %c0_i32 = arith.constant 0 : i32
    %c0_i32_0 = arith.constant 0 : i32
    %c0_i32_1 = arith.constant 0 : i32
    return %c0_i32, %c0_i32_0 : i32, i32
  }
  func.func @transform_6(%arg0: i32, %arg1: i32) -> (i32, i32) {
    %c0_i32 = arith.constant 0 : i32
    %c0_i32_0 = arith.constant 0 : i32
    %c0_i32_1 = arith.constant 0 : i32
    return %c0_i32, %c0_i32_0 : i32, i32
  }
  func.func @transform_7(%arg0: i32, %arg1: i32) -> (i32, i32) {
    %c0_i32 = arith.constant 0 : i32
    %c0_i32_0 = arith.constant 0 : i32
    return %arg0, %c0_i32 : i32, i32
  }
}

</mosaic_0001>

<bundles_post_ra>
// kernel: tpu_custom_call.1
= control target key start
LH: loop header
LB: loop body
LE: loop exit
PB: predicated region body
PF: predicated region fallthrough
CT: control target
= control target key end

     0   :  { %s3569_s0 = inlined_call_operand.hbm [shape: f32[256,256], index: 0, kind: input, shape index: {}]   ;;  %s3570_s1 = inlined_call_operand.hbm [shape: f32[256,512], index: 1, kind: input, shape index: {}]   ;;  %s3571_s2 = inlined_call_operand.vmem [shape: f32[1,512], index: 2, kind: input, shape index: {}]   ;;  %s3572_s3 = inlined_call_operand.hbm [shape: f32[512,256], index: 3, kind: input, shape index: {}]   ;;  %s3573_s4 = inlined_call_operand.vmem [shape: f32[1,256], index: 4, kind: input, shape index: {}]   ;;  %s3574_s5 = inlined_call_operand.vmem [shape: f32[1,256], index: 5, kind: input, shape index: {}]   ;;  %s3575_s6 = inlined_call_operand.vmem [shape: f32[1,256], index: 6, kind: input, shape index: {}]   ;;  %s3576_s7 = inlined_call_operand.hbm [shape: f32[256,256], index: 7, kind: output, shape index: {}]  }
   0x1   :  { %3609 = sst [smem:[#allocation33_spill]] %s3570_s1 }
   0x2   :  { %3610 = sst [smem:[#allocation34_spill]] %s3573_s4 }
   0x3   :  { %3611 = sst [smem:[#allocation35_spill]] %s3574_s5 }
   0x4   :  { %3612 = sst [smem:[#allocation36_spill]] %s3575_s6 }
   0x5   :  { %3613 = sst [smem:[#allocation37_spill]] %s3576_s7 }
   0x6   :  { %12 = vsyncpa [#allocation4], 0 }
   0x7   :  { %14 = vsyncpa [#allocation4 + $0x1], 0 }
   0x8   :  { %15 = vsyncpa [#allocation7], 0 }
   0x9   :  { %17 = vsyncpa [#allocation7 + $0x1], 0 }
   0xa   :  { %18 = vsyncpa [#allocation5], 0 }
   0xb   :  { %20 = vsyncpa [#allocation5 + $0x1], 0  ;;  %s2322_s24 = smov 0   ;;  %s2324_s25 = smov 0  }
   0xc   :  { %s2326_s26 = smov 0   ;;  %s2328_s27 = smov 0  }
   0xd   :  { %s2330_s28 = smov 0   ;;  %s2332_s29 = smov 0  }
   0xe   :  { %s2334_s30 = smov 0   ;;  %s2336_s8 = smov 0  }
   0xf   :  { %s2338_s9 = smov 0   ;;  %s2340_s10 = smov 0  }
  0x10   :  { %s2342_s11 = smov 0  }
  0x11 LB: > { %3614 = sst [smem:[#allocation13_spill]] %s2238_s26  ;;  %s35_s12 = sadd.s32 1, %s2262_s9  ;;  %s2270_s11 = sphi %s2342_s11, %s26_s11   ;;  %s2266_s10 = sphi %s2340_s10, %s3698_s10   ;;  %s2262_s9 = sphi %s2338_s9, %s3704_s9   ;;  %s2258_s8 = sphi %s2336_s8, %s3696_s8   ;;  %s2254_s30 = sphi %s2334_s30, %s3703_s30   ;;  %s2250_s29 = sphi %s2332_s29, %s3695_s29   ;;  %s2246_s28 = sphi %s2330_s28, %s3702_s28   ;;  %s2242_s27 = sphi %s2328_s27, %s3701_s27   ;;  %s2238_s26 = sphi %s2326_s26, %s3693_s26   ;;  %s2234_s25 = sphi %s2324_s25, %s3700_s25   ;;  %s2230_s24 = sphi %s2322_s24, %s3699_s24  }
  0x12   : > { %3615 = sst [smem:[#allocation14_spill]] %s2250_s29  ;;  %p3580_p0 = scmp.eq.s32.totalorder %s2270_s11, 0 }
  0x13   : > { %3616 = sst [smem:[#allocation15_spill]] %s2258_s8  ;;  %p2379_p1 = scmp.ge.s32.totalorder %s35_s12, 2 }
  0x14   : > { %3617 = sst [smem:[#allocation16_spill]] %s2266_s10  ;;  %s71_s14 = sadd.s32 1, %s2238_s26 }
  0x15   : > { %p78_p2 = scmp.ne.s32.totalorder %s2238_s26, %s2234_s25  ;;  %s3706_s12 = smov (%p2379_p1, %s35_s12), 0 }
  0x16   : > { %3619 = sst [smem:[#allocation17_spill]] %s3706_s12  ;;  %s68_s15 = ssub.s32 %s2262_s9, %s3706_s12 }
  0x17   : > { %p80_p4 = por %p78_p2, %p3580_p0  ;;  %p3579_p5 = scmp.lt.s32.totalorder %s2270_s11, 4 }
  0x18   : > { %p69_p6 = scmp.eq.s32.totalorder %s68_s15, 0  ;;  %s280_s16 = sand.u32 1, %s2270_s11  }
  0x19   : > { %s282_s18 = sand.u32 1, %s2238_s26   ;;  %s1771_s20 = sshll.u32 %s2262_s9, 8 }
  0x1a   : > { %s2399_s17 = scalar_select %p69_p6, %s2238_s26, %s71_s14  }
  0x1b   : > { %s2402_s19 = sshll.u32 %s282_s18, 9  ;;  %s3621_s1 = sld [smem:[#allocation33_spill]] }
  0x1c   : > { %3620 = sst [smem:[#allocation18_spill]] %s2399_s17  ;;  %s284_s12 = scalar_lea.vmem [#allocation6], %s2402_s19 }
  0x1d   : > { %s291_s7 = sshll.u32 %s284_s12, 4  ;;  %p2413_p7 = pnand %p3579_p5, %p80_p4  ;;  %s2417_s7 = int_to_ptr.vmem [resolvable:$true] %s291_s7 }
  0x1e   : > { %s2420_s15 = scalar_lea.sflag [#allocation7], %s280_s16 }
  0x1f   : > { %p3583_p10 = pneg %p2413_p7 }
  0x21   : > { %s2408_s23 = scalar_lea.hbm %s3621_s1, %s1771_s20  ;;  %s2059_s21 = scalar_lea.hbm %s3621_s1, 16384 }
  0x22   : > { %s2054_s18 = scalar_lea.hbm %s2408_s23, 8192  ;;  %p2060_p13 = scmp.lt.u32.totalorder %s2408_s23, %s3621_s1 }
  0x23   : > { %p2055_p9 = scmp.ne.s32.totalorder %s2408_s23, %s2054_s18  ;;  %p2061_p2 = scmp.lt.u32.totalorder %s2059_s21, %s2054_s18 }
  0x24   : > { %p2063_p6 = scmp.lt.u32.totalorder %s2054_s18, %s2408_s23 }
  0x25   : > { %p2057_p11 = pnand %p3583_p10, %p2055_p9  ;;  %p2062_p4 = por %p2061_p2, %p2060_p13 }
  0x27   : > { %p2058_p12 = pneg %p2057_p11  ;;  %p2064_p5 = por %p2063_p6, %p2062_p4 }
  0x29   : > { %p2065_p3 = pnand %p2064_p5, %p2058_p12 }
  0x2b   : > { %2068 = shalt.err (!%p2065_p3)
}
  0x2c   : > { %s2069_s16 = scalar_lea.vmem %s2417_s7, 8192  ;;  %s2272_s12 = smov [#allocation6]  }
  0x2d   : > { %p2070_p9 = scmp.ne.s32.totalorder %s2417_s7, %s2069_s16  ;;  %s2074_s20 = sshll.u32 %s2272_s12, 4  ;;  %s2075_s20 = int_to_ptr.vmem [resolvable:$false] %s2074_s20 }
  0x2e   : > { %s2076_s17 = scalar_lea.vmem %s2075_s20, 16384  ;;  %p2077_p8 = scmp.lt.s32.totalorder %s2417_s7, %s2075_s20 }
  0x2f   : > { %p2072_p11 = pnand %p2070_p9, %p3583_p10  ;;  %p2078_p13 = scmp.lt.s32.totalorder %s2076_s17, %s2069_s16 }
  0x31   : > { %p2073_p0 = pneg %p2072_p11  ;;  %p2079_p2 = por %p2078_p13, %p2077_p8 }
  0x33   : > { %p2080_p4 = pnand %p2079_p2, %p2073_p0 }
  0x35   : > { %2083 = shalt.err (!%p2080_p4)
}
  0x36   : > { %s2273_s18 = smov 512   ;;  %s3581_s21 = smov 256  }
  0x37   : > { %s3584_s22 = smov 16   ;;  %p329_p0 = scmp.lt.s32.totalorder %s2270_s11, 5 }
  0x38   : > { %1918 = dma.hbm_to_vmem [thread:$0]  (!%p2413_p7), %s2408_s23, 8192, %s2417_s7, %s2420_s15, %s2273_s18, %s3581_s21, %s3584_s22  }
  0x39   : > { %p3623_p3 = scmp.ge.s32.totalorder %s2270_s11, 1  ;;  %s2458_s12 = sadd.s32 4294967295, %s2270_s11  }
  0x3a   : > { %s1741_s20 = sadd.s32 4294967294, %s2270_s11   ;;  %s38_s17 = sadd.s32 1, %s2266_s10 }
  0x3b   : > { %p2453_p5 = pnand %p3623_p3, %p329_p0  ;;  %s45_s1 = sadd.s32 1, %s2250_s29 }
  0x3c   : > { %s3708_s17 = smov (!%p2379_p1, %s38_s17), %s2266_s10  ;;  %p52_p8 = scmp.ne.s32.totalorder %s2250_s29, %s2246_s28 }
  0x3d   : > { %s3624_s16 = scalar_select %p2453_p5, 1, 0 }
  0x3e   : > { %p58_p12 = scmp.ne.s32.totalorder %s2246_s28, %s2242_s27  ;;  %p40_p6 = scmp.ge.s32.totalorder %s3708_s17, 2 }
  0x3f   : > { %p59_p9 = scmp.eq.s32.totalorder %s2458_s12, 0  ;;  %p3625_p11 = scmp.eq.s32.totalorder %s2270_s11, 0 }
  0x40   : > { %p223_p2 = scmp.eq.s32.totalorder %s2458_s12, 3  ;;  %s3710_s17 = smov (%p40_p6, %s3708_s17), 0 }
  0x41   : > { %p2473_p13 = por %p3625_p11, %p52_p8  ;;  %3627 = sst [smem:[#allocation19_spill]] %s3710_s17 }
  0x42   : > { %p2483_p1 = por %p59_p9, %p58_p12  ;;  %p3629_p4 = scmp.ne.s32.totalorder %s2234_s25, %s2230_s24 }
  0x43   : > { %s42_s18 = ssub.s32 %s2266_s10, %s3710_s17  ;;  %p2496_p3 = por %p223_p2, %p52_p8 }
  0x44   : > { %s3628_s13 = scalar_select %p2483_p1, 1, 0 }
  0x45   : > { %p2490_p0 = por %p3629_p4, %p59_p9  ;;  %p43_p11 = scmp.eq.s32.totalorder %s42_s18, 0 }
  0x46   : > { %s3631_s21 = scalar_select %p2496_p3, 1, 0 }
  0x47   : > { %s3630_s23 = scalar_select %p2490_p0, 1, 0 }
  0x48   : > { %p229_p10 = scmp.eq.s32.totalorder %s1741_s20, 3  ;;  %s258_s22 = sand.u32 1, %s2250_s29  }
  0x49   : > { %s1770_s26 = sshll.u32 %s2266_s10, 12  ;;  %s1744_s24 = sshll.u32 %s258_s22, 8 }
  0x4a   : > { %s2503_s8 = scalar_select %p43_p11, %s2250_s29, %s45_s1  }
  0x4b   : > { %p2508_p6 = por %p229_p10, %p58_p12  ;;  %s2515_s17 = scalar_lea.hbm %s3569_s0, %s1770_s26 }
  0x4c   : > { %3632 = sst [smem:[#allocation20_spill]] %s2503_s8  ;;  %p3634_p8 = scmp.lt.s32.totalorder %s2270_s11, 4 }
  0x4d   : > { %s3633_s6 = scalar_select %p2508_p6, 1, 0 }
  0x4e   : > { %p2521_p9 = pnand %p3634_p8, %p2473_p13  ;;  %s262_s20 = scalar_lea.vmem [#allocation3], %s1744_s24 }
  0x4f   : > { %s270_s18 = sshll.u32 %s262_s20, 4  ;;  %s2527_s10 = scalar_lea.sflag [#allocation4], %s258_s22  ;;  %s2525_s18 = int_to_ptr.vmem [resolvable:$true] %s270_s18 }
  0x50   : > { %s2084_s4 = scalar_lea.hbm %s2515_s17, 4096  ;;  %p2086_p12 = pneg %p2521_p9 }
  0x51   : > { %p2085_p10 = scmp.ne.s32.totalorder %s2515_s17, %s2084_s4  ;;  %s2089_s7 = scalar_lea.hbm %s3569_s0, 8192 }
  0x52   : > { %p2090_p13 = scmp.lt.u32.totalorder %s2515_s17, %s3569_s0  ;;  %p2091_p11 = scmp.lt.u32.totalorder %s2089_s7, %s2084_s4 }
  0x53   : > { %p2087_p2 = pnand %p2086_p12, %p2085_p10  ;;  %p2093_p6 = scmp.lt.u32.totalorder %s2084_s4, %s2515_s17 }
  0x54   : > { %p2092_p8 = por %p2091_p11, %p2090_p13 }
  0x55   : > { %p2088_p4 = pneg %p2087_p2 }
  0x56   : > { %p2094_p3 = por %p2093_p6, %p2092_p8 }
  0x58   : > { %p2095_p0 = pnand %p2094_p3, %p2088_p4 }
  0x5a   : > { %2098 = shalt.err (!%p2095_p0)
}
  0x5b   : > { %s2099_s22 = scalar_lea.vmem %s2525_s18, 4096  ;;  %s2276_s24 = smov [#allocation3]  }
  0x5c   : > { %p2100_p10 = scmp.ne.s32.totalorder %s2525_s18, %s2099_s22  ;;  %s2104_s20 = sshll.u32 %s2276_s24, 4  ;;  %s2105_s20 = int_to_ptr.vmem [resolvable:$false] %s2104_s20 }
  0x5d   : > { %s2106_s29 = scalar_lea.vmem %s2105_s20, 8192  ;;  %p2107_p5 = scmp.lt.s32.totalorder %s2525_s18, %s2105_s20 }
  0x5e   : > { %p2102_p2 = pnand %p2100_p10, %p2086_p12  ;;  %p2108_p13 = scmp.lt.s32.totalorder %s2106_s29, %s2099_s22 }
  0x60   : > { %p2103_p1 = pneg %p2102_p2  ;;  %p2109_p11 = por %p2108_p13, %p2107_p5 }
  0x62   : > { %p2110_p6 = pnand %p2109_p11, %p2103_p1 }
  0x64   : > { %2113 = shalt.err (!%p2110_p6)
}
  0x65   : > { %s3636_s8 = smov 16   ;;  %s3637_s4 = smov 256  }
  0x66   : > { %1915 = dma.hbm_to_vmem [thread:$0]  (!%p2521_p9), %s2515_s17, 4096, %s2525_s18, %s2527_s10, %s3637_s4, %s3637_s4, %s3636_s8  }
  0x67   : > { %s1773_s5 = sshll.u32 %s2262_s9, 13  ;;  %s313_s26 = scalar_lea.vmem [#allocation8], %s2402_s19 }
  0x68   : > { %s321_s7 = sshll.u32 %s313_s26, 4  ;;  %s2563_s20 = scalar_lea.hbm %s3572_s3, %s1773_s5  ;;  %s2565_s7 = int_to_ptr.vmem [resolvable:$true] %s321_s7 }
  0x69   : > { %s2114_s1 = scalar_lea.hbm %s2563_s20, 8192  ;;  %p3638_p1 = pneg %p2413_p7 }
  0x6a   : > { %p2115_p5 = scmp.ne.s32.totalorder %s2563_s20, %s2114_s1  ;;  %s2119_s17 = scalar_lea.hbm %s3572_s3, 16384 }
  0x6b   : > { %p2120_p9 = scmp.lt.u32.totalorder %s2563_s20, %s3572_s3  ;;  %p2121_p12 = scmp.lt.u32.totalorder %s2119_s17, %s2114_s1 }
  0x6c   : > { %p2117_p0 = pnand %p2115_p5, %p3638_p1  ;;  %p2123_p8 = scmp.lt.u32.totalorder %s2114_s1, %s2563_s20 }
  0x6d   : > { %p2122_p4 = por %p2121_p12, %p2120_p9 }
  0x6e   : > { %p2118_p3 = pneg %p2117_p0 }
  0x6f   : > { %p2124_p10 = por %p2123_p8, %p2122_p4 }
  0x71   : > { %p2125_p2 = pnand %p2124_p10, %p2118_p3 }
  0x73   : > { %2128 = shalt.err (!%p2125_p2)
}
  0x74   : > { %s2129_s5 = scalar_lea.vmem %s2565_s7, 8192  ;;  %p3639_p11 = pmov %p3638_p1 }
  0x75   : > { %p2130_p13 = scmp.ne.s32.totalorder %s2565_s7, %s2129_s5  ;;  %s2277_s26 = smov [#allocation8]  }
  0x76   : > { %s2134_s24 = sshll.u32 %s2277_s26, 4  ;;  %s2135_s24 = int_to_ptr.vmem [resolvable:$false] %s2134_s24 }
  0x77   : > { %p2132_p6 = pnand %p2130_p13, %p3639_p11  ;;  %s2136_s22 = scalar_lea.vmem %s2135_s24, 16384 }
  0x78   : > { %p2137_p1 = scmp.lt.s32.totalorder %s2565_s7, %s2135_s24  ;;  %p2138_p0 = scmp.lt.s32.totalorder %s2136_s22, %s2129_s5 }
  0x79   : > { %p2133_p5 = pneg %p2132_p6 }
  0x7a   : > { %p2139_p9 = por %p2138_p0, %p2137_p1 }
  0x7c   : > { %p2140_p12 = pnand %p2139_p9, %p2133_p5 }
  0x7e   : > { %2143 = shalt.err (!%p2140_p12)
}
  0x7f   : > { %1921 = dma.hbm_to_vmem [thread:$0]  (!%p2413_p7), %s2563_s20, 8192, %s2565_s7, %s2420_s15, %s3637_s4, %s3637_s4, %s3636_s8  }
  0x80   : > { %p3640_p3 = scmp.ne.s32.totalorder %s3624_s16, 0 }
  0x81   : > { %s2597_s1 = sand.u32 (!%p3640_p3), 1, %s2246_s28   ;;  %p3641_p4 = scmp.ne.s32.totalorder (!%p3640_p3), %s3628_s13, 0 }
  0x82   : > { %333 = sbr.rel (%p3640_p3) target bundleno = 1004 (0x3ec), region = 48  ;;  %s1756_s10 = sshll.u32 (!%p3640_p3), %s2597_s1, 8 }
  0x83   : > { %s336_s19 = scalar_lea.sflag (!%p3640_p3), [#allocation4], %s2597_s1  ;;  %s2601_s17 = scalar_lea.vmem (!%p3640_p3), [#allocation3], %s1756_s10 }
  0x89   : > { %2217 = dma.done.wait (%p3641_p4), %s336_s19, 4096  }
  0x8a   : > { %2219 = vsyncadd (%p3641_p4), %s336_s19, 4294963200  ;;  %s344_s14 = sand.u32 1, %s2458_s12   ;;  %s346_s15 = sand.u32 1, %s2234_s25  }
  0x8b   : > { %s1757_s16 = sshll.u32 %s346_s15, 9  ;;  %s345_s8 = scalar_lea.sflag [#allocation7], %s344_s14 }
  0x8c   : > { %s2609_s4 = scalar_lea.vmem [#allocation6], %s1757_s16  ;;  %p3642_p7 = scmp.ne.s32.totalorder %s3630_s23, 0 }
  0x8e   : > { %2221 = dma.done.wait (%p3642_p7), %s345_s8, 16384  }
  0x8f   : > { %2223 = vsyncadd (%p3642_p7), %s345_s8, 4294950912  ;;  %s1760_s7 = sshll.u32 %s2254_s30, 1  ;;  %s2622_s18 = scalar_lea.vmem [#allocation8], %s1757_s16 }
  0x90   : > { %p405_p8 = scmp.lt.s32.totalorder %s1760_s7, 3  ;;  %s2624_s29 = scalar_lea.vmem [#allocation9], %s1756_s10 }
  0x91   : > { %p1761_p10 = scmp.ne.s32.totalorder %s2254_s30, 0 }
  0x92   : > { %s3712_s7 = smov (!%p405_p8, %s1760_s7), 3  ;;  %v2278_v0 = vmov (!%p1761_p10), 0.0  }
  0x93   : > { %s407_s12 = scalar_lea.vmem %s3571_s2, %s3712_s7  ;;  %414 = sbr.rel (%p1761_p10) target bundleno = 163 (0xa3), region = 64  ;;  %415 = vst [vmem:[#allocation2] sm:$0xff] (!%p1761_p10), %v2278_v0  ;;  %416 = vst [vmem:[#allocation2 + $0x8] sm:$0xff] (!%p1761_p10), %v2278_v0 }
  0x94   : > { %417 = vst [vmem:[#allocation2 + $0x10] sm:$0xff] (!%p1761_p10), %v2278_v0  ;;  %418 = vst [vmem:[#allocation2 + $0x18] sm:$0xff] (!%p1761_p10), %v2278_v0 }
  0x95   : > { %419 = vst [vmem:[#allocation2 + $0x20] sm:$0xff] (!%p1761_p10), %v2278_v0  ;;  %420 = vst [vmem:[#allocation2 + $0x28] sm:$0xff] (!%p1761_p10), %v2278_v0 }
  0x96   : > { %421 = vst [vmem:[#allocation2 + $0x30] sm:$0xff] (!%p1761_p10), %v2278_v0  ;;  %422 = vst [vmem:[#allocation2 + $0x38] sm:$0xff] (!%p1761_p10), %v2278_v0 }
  0x97   : > { %423 = vst [vmem:[#allocation2 + $0x40] sm:$0xff] (!%p1761_p10), %v2278_v0  ;;  %424 = vst [vmem:[#allocation2 + $0x48] sm:$0xff] (!%p1761_p10), %v2278_v0 }
  0x98   : > { %425 = vst [vmem:[#allocation2 + $0x50] sm:$0xff] (!%p1761_p10), %v2278_v0  ;;  %426 = vst [vmem:[#allocation2 + $0x58] sm:$0xff] (!%p1761_p10), %v2278_v0 }
  0x99   : > { %427 = vst [vmem:[#allocation2 + $0x60] sm:$0xff] (!%p1761_p10), %v2278_v0  ;;  %428 = vst [vmem:[#allocation2 + $0x68] sm:$0xff] (!%p1761_p10), %v2278_v0 }
  0x9a   : > { %429 = vst [vmem:[#allocation2 + $0x70] sm:$0xff] %v2278_v0  ;;  %430 = vst [vmem:[#allocation2 + $0x78] sm:$0xff] %v2278_v0 }
  0x9b   : > { %431 = vst [vmem:[#allocation2 + $0x80] sm:$0xff] %v2278_v0  ;;  %432 = vst [vmem:[#allocation2 + $0x88] sm:$0xff] %v2278_v0 }
  0x9c   : > { %433 = vst [vmem:[#allocation2 + $0x90] sm:$0xff] %v2278_v0  ;;  %434 = vst [vmem:[#allocation2 + $0x98] sm:$0xff] %v2278_v0 }
  0x9d   : > { %435 = vst [vmem:[#allocation2 + $0xa0] sm:$0xff] %v2278_v0  ;;  %436 = vst [vmem:[#allocation2 + $0xa8] sm:$0xff] %v2278_v0 }
  0x9e   : > { %437 = vst [vmem:[#allocation2 + $0xb0] sm:$0xff] %v2278_v0  ;;  %438 = vst [vmem:[#allocation2 + $0xb8] sm:$0xff] %v2278_v0 }
  0x9f   : > { %439 = vst [vmem:[#allocation2 + $0xc0] sm:$0xff] %v2278_v0  ;;  %440 = vst [vmem:[#allocation2 + $0xc8] sm:$0xff] %v2278_v0 }
  0xa0   : > { %441 = vst [vmem:[#allocation2 + $0xd0] sm:$0xff] %v2278_v0  ;;  %442 = vst [vmem:[#allocation2 + $0xd8] sm:$0xff] %v2278_v0 }
  0xa1   : > { %443 = vst [vmem:[#allocation2 + $0xe0] sm:$0xff] %v2278_v0  ;;  %444 = vst [vmem:[#allocation2 + $0xe8] sm:$0xff] %v2278_v0 }
  0xa2   : > { %445 = vst [vmem:[#allocation2 + $0xf0] sm:$0xff] %v2278_v0  ;;  %446 = vst [vmem:[#allocation2 + $0xf8] sm:$0xff] %v2278_v0 }
  0xa3 PF: > { %v480_v1 = vld [vmem:[%s2609_s4 + $0x8] sm:$0xff]  ;;  %v482_v2 = vld [vmem:[%s2609_s4 + $0x18] sm:$0xff]  ;;  %v479_v3 = vld [vmem:[%s2609_s4] sm:$0xff]  ;;  %p1762_p2 = scmp.ne.s32.totalorder %s2254_s30, 1 }
  0xa4   : > { %v1776_v4 = vpack.c.bf16 %v482_v2, %v480_v1  ;;  %v481_v5 = vld [vmem:[%s2609_s4 + $0x10] sm:$0xff]  ;;  %v484_v6 = vld [vmem:[%s2609_s4 + $0x28] sm:$0xff]  ;;  %v486_v7 = vld [vmem:[%s2609_s4 + $0x38] sm:$0xff] }
  0xa5   : > { %v1778_v8 = vpack.c.bf16 %v481_v5, %v479_v3  ;;  %v1780_v9 = vpack.c.bf16 %v486_v7, %v484_v6  ;;  %v483_v10 = vld [vmem:[%s2609_s4 + $0x20] sm:$0xff]  ;;  %v485_v11 = vld [vmem:[%s2609_s4 + $0x30] sm:$0xff]  ;;  %v488_v12 = vld [vmem:[%s2609_s4 + $0x48] sm:$0xff] }
  0xa6   : > { %1777 = vmatprep.subr.bf16.mxu0 %v1776_v4  ;;  %v490_v13 = vld [vmem:[%s2609_s4 + $0x58] sm:$0xff]  ;;  %v1782_v14 = vpack.c.bf16 %v485_v11, %v483_v10  ;;  %v487_v16 = vld [vmem:[%s2609_s4 + $0x40] sm:$0xff]  ;;  %v489_v17 = vld [vmem:[%s2609_s4 + $0x50] sm:$0xff] }
  0xa7   : > { %1779 = vmatpush1.bf16.msra.mxu0 %v1778_v8  ;;  %v1784_v15 = vpack.c.bf16 %v490_v13, %v488_v12  ;;  %v492_v18 = vld [vmem:[%s2609_s4 + $0x68] sm:$0xff]  ;;  %v494_v19 = vld [vmem:[%s2609_s4 + $0x78] sm:$0xff]  ;;  %v1786_v20 = vpack.c.bf16 %v489_v17, %v487_v16  ;;  %v491_v22 = vld [vmem:[%s2609_s4 + $0x60] sm:$0xff] }
  0xa8   : > { %1781 = vmatprep.subr.bf16.mxu0 %v1780_v9  ;;  %v1788_v21 = vpack.c.bf16 %v494_v19, %v492_v18  ;;  %v493_v23 = vld [vmem:[%s2609_s4 + $0x70] sm:$0xff]  ;;  %v496_v24 = vld [vmem:[%s2609_s4 + $0x88] sm:$0xff]  ;;  %v498_v25 = vld [vmem:[%s2609_s4 + $0x98] sm:$0xff] }
  0xa9   : > { %v1790_v26 = vpack.c.bf16 %v493_v23, %v491_v22  ;;  %v1792_v27 = vpack.c.bf16 %v498_v25, %v496_v24  ;;  %v495_v28 = vld [vmem:[%s2609_s4 + $0x80] sm:$0xff]  ;;  %v497_v29 = vld [vmem:[%s2609_s4 + $0x90] sm:$0xff]  ;;  %v500_v30 = vld [vmem:[%s2609_s4 + $0xa8] sm:$0xff] }
  0xaa   : > { %v502_v31 = vld [vmem:[%s2609_s4 + $0xb8] sm:$0xff]  ;;  %v1794_v32 = vpack.c.bf16 %v497_v29, %v495_v28  ;;  %v499_v34 = vld [vmem:[%s2609_s4 + $0xa0] sm:$0xff]  ;;  %v501_v35 = vld [vmem:[%s2609_s4 + $0xb0] sm:$0xff] }
  0xab   : > { %1783 = vmatpush1.bf16.msra.mxu0 %v1782_v14  ;;  %v1796_v33 = vpack.c.bf16 %v502_v31, %v500_v30  ;;  %v504_v36 = vld [vmem:[%s2609_s4 + $0xc8] sm:$0xff]  ;;  %v506_v37 = vld [vmem:[%s2609_s4 + $0xd8] sm:$0xff]  ;;  %v1798_v38 = vpack.c.bf16 %v501_v35, %v499_v34  ;;  %v503_v40 = vld [vmem:[%s2609_s4 + $0xc0] sm:$0xff] }
  0xac   : > { %1785 = vmatprep.subr.bf16.mxu0 %v1784_v15  ;;  %v1800_v39 = vpack.c.bf16 %v506_v37, %v504_v36  ;;  %v505_v41 = vld [vmem:[%s2609_s4 + $0xd0] sm:$0xff]  ;;  %v2656_v42 = vld [vmem:[%s2601_s17 + $0x8] sm:$0xff]  ;;  %v510_v44 = vld [vmem:[%s2609_s4 + $0xf8] sm:$0xff] }
  0xad   : > { %v508_v43 = vld [vmem:[%s2609_s4 + $0xe8] sm:$0xff]  ;;  %619 = vmatprep.mubr.f32.mxu0 %v2656_v42  ;;  %v1802_v45 = vpack.c.bf16 %v505_v41, %v503_v40  ;;  %v507_v47 = vld [vmem:[%s2609_s4 + $0xe0] sm:$0xff]  ;;  %v509_v48 = vld [vmem:[%s2609_s4 + $0xf0] sm:$0xff] }
  0xae   : > { %v1804_v46 = vpack.c.bf16 %v510_v44, %v508_v43  ;;  %v512_v49 = vld [vmem:[%s2609_s4 + $0x108] sm:$0xff]  ;;  %v514_v50 = vld [vmem:[%s2609_s4 + $0x118] sm:$0xff]  ;;  %v1806_v51 = vpack.c.bf16 %v509_v48, %v507_v47  ;;  %v511_v53 = vld [vmem:[%s2609_s4 + $0x100] sm:$0xff] }
  0xaf   : > { %1787 = vmatpush1.bf16.msra.mxu0 %v1786_v20  ;;  %v1808_v52 = vpack.c.bf16 %v514_v50, %v512_v49  ;;  %v513_v54 = vld [vmem:[%s2609_s4 + $0x110] sm:$0xff]  ;;  %v516_v55 = vld [vmem:[%s2609_s4 + $0x128] sm:$0xff]  ;;  %v518_v56 = vld [vmem:[%s2609_s4 + $0x138] sm:$0xff] }
  0xb0   : > { %1789 = vmatprep.subr.bf16.mxu0 %v1788_v21  ;;  %v515_v57 = vld [vmem:[%s2609_s4 + $0x120] sm:$0xff]  ;;  %v517_v58 = vld [vmem:[%s2609_s4 + $0x130] sm:$0xff]  ;;  %v1810_v59 = vpack.c.bf16 %v513_v54, %v511_v53  ;;  %v520_v60 = vld [vmem:[%s2609_s4 + $0x148] sm:$0xff]  ;;  %v1812_v1 = vpack.c.bf16 %v518_v56, %v516_v55 }
  0xb1   : > { %v522_v61 = vld [vmem:[%s2609_s4 + $0x158] sm:$0xff]  ;;  %v781_v62 = vld [vmem:[%s2622_s18 + $0x8] sm:$0xff]  ;;  %v780_v0 = vld [vmem:[%s2622_s18] sm:$0xff]  ;;  %v1814_v12 = vpack.c.bf16 %v517_v58, %v515_v57 }
  0xb2   : > { %v783_v63 = vld [vmem:[%s2622_s18 + $0x18] sm:$0xff]  ;;  %v782_v3 = vld [vmem:[%s2622_s18 + $0x10] sm:$0xff]  ;;  %v785_v4 = vld [vmem:[%s2622_s18 + $0x28] sm:$0xff]  ;;  %v1816_v16 = vpack.c.bf16 %v522_v61, %v520_v60 }
  0xb3   : > { %1791 = vmatpush1.bf16.msra.mxu0 %v1790_v26  ;;  %v1840_v2 = vpack.c.bf16 %v783_v63, %v781_v62  ;;  %v787_v5 = vld [vmem:[%s2622_s18 + $0x38] sm:$0xff]  ;;  %v1842_v6 = vpack.c.bf16 %v782_v3, %v780_v0  ;;  %v784_v8 = vld [vmem:[%s2622_s18 + $0x20] sm:$0xff]  ;;  %v786_v9 = vld [vmem:[%s2622_s18 + $0x30] sm:$0xff] }
  0xb4   : > { %1793 = vmatprep.subr.bf16.mxu0 %v1792_v27  ;;  %v1844_v7 = vpack.c.bf16 %v787_v5, %v785_v4  ;;  %v789_v10 = vld [vmem:[%s2622_s18 + $0x48] sm:$0xff]  ;;  %v791_v11 = vld [vmem:[%s2622_s18 + $0x58] sm:$0xff]  ;;  %v519_v13 = vld [vmem:[%s2609_s4 + $0x140] sm:$0xff]  ;;  %v1846_v15 = vpack.c.bf16 %v786_v9, %v784_v8 }
  0xb5   : > { %1841 = vmatprep.subr.bf16.mxu1 %v1840_v2  ;;  %v521_v14 = vld [vmem:[%s2609_s4 + $0x150] sm:$0xff]  ;;  %v524_v17 = vld [vmem:[%s2609_s4 + $0x168] sm:$0xff]  ;;  %v1848_v18 = vpack.c.bf16 %v791_v11, %v789_v10  ;;  %v788_v19 = vld [vmem:[%s2622_s18 + $0x40] sm:$0xff] }
  0xb6   : > { %1843 = vmatpush1.bf16.msra.mxu1 %v1842_v6  ;;  %v790_v20 = vld [vmem:[%s2622_s18 + $0x50] sm:$0xff]  ;;  %v526_v21 = vld [vmem:[%s2609_s4 + $0x178] sm:$0xff]  ;;  %v793_v22 = vld [vmem:[%s2622_s18 + $0x68] sm:$0xff]  ;;  %v1818_v24 = vpack.c.bf16 %v521_v14, %v519_v13 }
  0xb7   : > { %1795 = vmatpush1.bf16.msra.mxu0 %v1794_v32  ;;  %1845 = vmatprep.subr.bf16.mxu1 %v1844_v7  ;;  %v795_v23 = vld [vmem:[%s2622_s18 + $0x78] sm:$0xff]  ;;  %v523_v25 = vld [vmem:[%s2609_s4 + $0x160] sm:$0xff]  ;;  %v525_v26 = vld [vmem:[%s2609_s4 + $0x170] sm:$0xff]  ;;  %v1850_v27 = vpack.c.bf16 %v790_v20, %v788_v19  ;;  %v1820_v28 = vpack.c.bf16 %v526_v21, %v524_v17 }
  0xb8   : > { %1797 = vmatprep.subr.bf16.mxu0 %v1796_v33  ;;  %v528_v29 = vld [vmem:[%s2609_s4 + $0x188] sm:$0xff]  ;;  %v1852_v30 = vpack.c.bf16 %v795_v23, %v793_v22  ;;  %v792_v31 = vld [vmem:[%s2622_s18 + $0x60] sm:$0xff]  ;;  %v794_v32 = vld [vmem:[%s2622_s18 + $0x70] sm:$0xff]  ;;  %v1822_v36 = vpack.c.bf16 %v525_v26, %v523_v25 }
  0xb9   : > { %v530_v33 = vld [vmem:[%s2609_s4 + $0x198] sm:$0xff]  ;;  %v797_v34 = vld [vmem:[%s2622_s18 + $0x88] sm:$0xff]  ;;  %v527_v37 = vld [vmem:[%s2609_s4 + $0x180] sm:$0xff] }
  0xba   : > { %1847 = vmatpush1.bf16.msra.mxu1 %v1846_v15  ;;  %v799_v35 = vld [vmem:[%s2622_s18 + $0x98] sm:$0xff]  ;;  %v1824_v40 = vpack.c.bf16 %v530_v33, %v528_v29  ;;  %v532_v41 = vld [vmem:[%s2609_s4 + $0x1a8] sm:$0xff]  ;;  %v796_v44 = vld [vmem:[%s2622_s18 + $0x80] sm:$0xff] }
  0xbb   : > { %1799 = vmatpush1.bf16.msra.mxu0 %v1798_v38  ;;  %1849 = vmatprep.subr.bf16.mxu1 %v1848_v18  ;;  %v529_v38 = vld [vmem:[%s2609_s4 + $0x190] sm:$0xff]  ;;  %v1856_v43 = vpack.c.bf16 %v799_v35, %v797_v34  ;;  %v801_v47 = vld [vmem:[%s2622_s18 + $0xa8] sm:$0xff]  ;;  %v803_v48 = vld [vmem:[%s2622_s18 + $0xb8] sm:$0xff] }
  0xbc   : > { %1801 = vmatprep.subr.bf16.mxu0 %v1800_v39  ;;  %v1854_v39 = vpack.c.bf16 %v794_v32, %v792_v31  ;;  %v1826_v49 = vpack.c.bf16 %v529_v38, %v527_v37  ;;  %v531_v50 = vld [vmem:[%s2609_s4 + $0x1a0] sm:$0xff]  ;;  %v536_v54 = vld [vmem:[%s2609_s4 + $0x1c8] sm:$0xff]  ;;  %v1860_v55 = vpack.c.bf16 %v803_v48, %v801_v47  ;;  %v802_v57 = vld [vmem:[%s2622_s18 + $0xb0] sm:$0xff] }
  0xbd   : > { %v800_v56 = vld [vmem:[%s2622_s18 + $0xa0] sm:$0xff]  ;;  %v538_v58 = vld [vmem:[%s2609_s4 + $0x1d8] sm:$0xff]  ;;  %v537_v63 = vld [vmem:[%s2609_s4 + $0x1d0] sm:$0xff] }
  0xbe   : > { %1851 = vmatpush1.bf16.msra.mxu1 %v1850_v27  ;;  %v807_v60 = vld [vmem:[%s2622_s18 + $0xd8] sm:$0xff]  ;;  %v535_v62 = vld [vmem:[%s2609_s4 + $0x1c0] sm:$0xff]  ;;  %v1862_v0 = vpack.c.bf16 %v802_v57, %v800_v56  ;;  %v540_v2 = vld [vmem:[%s2609_s4 + $0x1e8] sm:$0xff] }
  0xbf   : > { %1803 = vmatpush1.bf16.msra.mxu0 %v1802_v45  ;;  %1853 = vmatprep.subr.bf16.mxu1 %v1852_v30  ;;  %v798_v45 = vld [vmem:[%s2622_s18 + $0x90] sm:$0xff]  ;;  %v804_v4 = vld [vmem:[%s2622_s18 + $0xc0] sm:$0xff]  ;;  %v542_v6 = vld [vmem:[%s2609_s4 + $0x1f8] sm:$0xff]  ;;  %v1834_v9 = vpack.c.bf16 %v537_v63, %v535_v62 }
  0xc0   : > { %1805 = vmatprep.subr.bf16.mxu0 %v1804_v46  ;;  %v534_v46 = vld [vmem:[%s2609_s4 + $0x1b8] sm:$0xff]  ;;  %v806_v5 = vld [vmem:[%s2622_s18 + $0xd0] sm:$0xff]  ;;  %v809_v7 = vld [vmem:[%s2622_s18 + $0xe8] sm:$0xff] }
  0xc1   : > { %v1828_v53 = vpack.c.bf16 %v534_v46, %v532_v41  ;;  %v811_v8 = vld [vmem:[%s2622_s18 + $0xf8] sm:$0xff]  ;;  %v539_v10 = vld [vmem:[%s2609_s4 + $0x1e0] sm:$0xff]  ;;  %v1866_v11 = vpack.c.bf16 %v806_v5, %v804_v4  ;;  %v541_v13 = vld [vmem:[%s2609_s4 + $0x1f0] sm:$0xff] }
  0xc2   : > { %1855 = vmatpush1.bf16.msra.mxu1 %v1854_v39  ;;  %v1868_v14 = vpack.c.bf16 %v811_v8, %v809_v7  ;;  %v808_v15 = vld [vmem:[%s2622_s18 + $0xe0] sm:$0xff]  ;;  %v813_v17 = vld [vmem:[%s2622_s18 + $0x108] sm:$0xff]  ;;  %v815_v18 = vld [vmem:[%s2622_s18 + $0x118] sm:$0xff]  ;;  %v1838_v19 = vpack.c.bf16 %v541_v13, %v539_v10 }
  0xc3   : > { %1807 = vmatpush1.bf16.msra.mxu0 %v1806_v51  ;;  %v533_v51 = vld [vmem:[%s2609_s4 + $0x1b0] sm:$0xff]  ;;  %1857 = vmatprep.subr.bf16.mxu1 %v1856_v43  ;;  %v1872_v21 = vpack.c.bf16 %v815_v18, %v813_v17  ;;  %v812_v22 = vld [vmem:[%s2622_s18 + $0x100] sm:$0xff]  ;;  %v819_v25 = vld [vmem:[%s2622_s18 + $0x138] sm:$0xff] }
  0xc4   : > { %1809 = vmatprep.subr.bf16.mxu0 %v1808_v52  ;;  %v1858_v52 = vpack.c.bf16 %v798_v45, %v796_v44  ;;  %v1830_v61 = vpack.c.bf16 %v533_v51, %v531_v50  ;;  %v814_v23 = vld [vmem:[%s2622_s18 + $0x110] sm:$0xff]  ;;  %v2734_v26 = vld [vmem:[%s2601_s17] sm:$0xff]  ;;  %v821_v32 = vld [vmem:[%s2622_s18 + $0x148] sm:$0xff] }
  0xc5   : > { %v1874_v27 = vpack.c.bf16 %v814_v23, %v812_v22  ;;  %v816_v30 = vld [vmem:[%s2622_s18 + $0x120] sm:$0xff]  ;;  %v818_v31 = vld [vmem:[%s2622_s18 + $0x130] sm:$0xff]  ;;  %v823_v33 = vld [vmem:[%s2622_s18 + $0x158] sm:$0xff] }
  0xc6   : > { %1859 = vmatpush1.bf16.msra.mxu1 %v1858_v52  ;;  %v2746_v34 = vld [vmem:[%s2601_s17 + $0x10] sm:$0xff]  ;;  %v1878_v35 = vpack.c.bf16 %v818_v31, %v816_v30  ;;  %v1880_v37 = vpack.c.bf16 %v823_v33, %v821_v32  ;;  %v820_v38 = vld [vmem:[%s2622_s18 + $0x140] sm:$0xff]  ;;  %v827_v41 = vld [vmem:[%s2622_s18 + $0x178] sm:$0xff] }
  0xc7   : > { %1811 = vmatpush1.bf16.msra.mxu0 %v1810_v59  ;;  %v805_v59 = vld [vmem:[%s2622_s18 + $0xc8] sm:$0xff]  ;;  %1861 = vmatprep.subr.bf16.mxu1 %v1860_v55  ;;  %v822_v39 = vld [vmem:[%s2622_s18 + $0x150] sm:$0xff]  ;;  %v2758_v43 = vld [vmem:[%s2601_s17 + $0x20] sm:$0xff] }
  0xc8   : > { %1813 = vmatprep.subr.bf16.mxu0 %v1812_v1  ;;  %v1832_v1 = vpack.c.bf16 %v538_v58, %v536_v54  ;;  %v1864_v3 = vpack.c.bf16 %v807_v60, %v805_v59  ;;  %v1882_v44 = vpack.c.bf16 %v822_v39, %v820_v38  ;;  %v2761_v45 = vld [vmem:[%s2601_s17 + $0x38] sm:$0xff]  ;;  %v824_v47 = vld [vmem:[%s2622_s18 + $0x160] sm:$0xff]  ;;  %v826_v48 = vld [vmem:[%s2622_s18 + $0x170] sm:$0xff]  ;;  %v545_v39 = vlaneseq }
  0xc9   : > { %v831_v50 = vld [vmem:[%s2622_s18 + $0x198] sm:$0xff]  ;;  %v2770_v51 = vld [vmem:[%s2601_s17 + $0x30] sm:$0xff]  ;;  %v1886_v52 = vpack.c.bf16 %v826_v48, %v824_v47  ;;  %v828_v55 = vld [vmem:[%s2622_s18 + $0x180] sm:$0xff] }
  0xca   : > { %1863 = vmatpush1.bf16.msra.mxu1 %v1862_v0  ;;  %v830_v56 = vld [vmem:[%s2622_s18 + $0x190] sm:$0xff]  ;;  %v833_v57 = vld [vmem:[%s2622_s18 + $0x1a8] sm:$0xff]  ;;  %v835_v58 = vld [vmem:[%s2622_s18 + $0x1b8] sm:$0xff] }
  0xcb   : > { %1815 = vmatpush1.bf16.msra.mxu0 %v1814_v12  ;;  %v1836_v12 = vpack.c.bf16 %v542_v6, %v540_v2  ;;  %1865 = vmatprep.subr.bf16.mxu1 %v1864_v3  ;;  %v2782_v59 = vld [vmem:[%s2601_s17 + $0x40] sm:$0xff]  ;;  %v1890_v60 = vpack.c.bf16 %v830_v56, %v828_v55  ;;  %v1892_v62 = vpack.c.bf16 %v835_v58, %v833_v57  ;;  %v834_v0 = vld [vmem:[%s2622_s18 + $0x1b0] sm:$0xff]  ;;  %v839_v2 = vld [vmem:[%s2622_s18 + $0x1d8] sm:$0xff] }
  0xcc   : > { %1817 = vmatprep.subr.bf16.mxu0 %v1816_v16  ;;  %v810_v16 = vld [vmem:[%s2622_s18 + $0xf0] sm:$0xff]  ;;  %v832_v63 = vld [vmem:[%s2622_s18 + $0x1a0] sm:$0xff]  ;;  %v2797_v5 = vld [vmem:[%s2601_s17 + $0x68] sm:$0xff] }
  0xcd   : > { %v1870_v20 = vpack.c.bf16 %v810_v16, %v808_v15  ;;  %v2794_v3 = vld [vmem:[%s2601_s17 + $0x50] sm:$0xff]  ;;  %v1894_v4 = vpack.c.bf16 %v834_v0, %v832_v63  ;;  %v2802_v7 = vld [vmem:[%s2601_s17 + $0x60] sm:$0xff]  ;;  %v2805_v8 = vld [vmem:[%s2601_s17 + $0x78] sm:$0xff] }
  0xce   : > { %1867 = vmatpush1.bf16.msra.mxu1 %v1866_v11  ;;  %v2813_v10 = vld [vmem:[%s2601_s17 + $0x88] sm:$0xff]  ;;  %v2818_v11 = vld [vmem:[%s2601_s17 + $0x80] sm:$0xff]  ;;  %v2826_v13 = vld [vmem:[%s2601_s17 + $0x90] sm:$0xff] }
  0xcf   : > { %1819 = vmatpush1.bf16.msra.mxu0 %v1818_v24  ;;  %1869 = vmatprep.subr.bf16.mxu1 %v1868_v14  ;;  %v817_v24 = vld [vmem:[%s2622_s18 + $0x128] sm:$0xff]  ;;  %v2834_v15 = vld [vmem:[%s2601_s17 + $0xa0] sm:$0xff]  ;;  %v2837_v16 = vld [vmem:[%s2601_s17 + $0xb8] sm:$0xff] }
  0xd0   : > { %1821 = vmatprep.subr.bf16.mxu0 %v1820_v28  ;;  %v2737_v28 = vld [vmem:[%s2601_s17 + $0x18] sm:$0xff]  ;;  %v1876_v29 = vpack.c.bf16 %v819_v25, %v817_v24  ;;  %v2829_v14 = vld [vmem:[%s2601_s17 + $0xa8] sm:$0xff]  ;;  %v2842_v17 = vld [vmem:[%s2601_s17 + $0xb0] sm:$0xff] }
  0xd1   : > { %v2845_v18 = vld [vmem:[%s2601_s17 + $0xc8] sm:$0xff]  ;;  %v2866_v23 = vld [vmem:[%s2601_s17 + $0xe0] sm:$0xff]  ;;  %v2869_v24 = vld [vmem:[%s2601_s17 + $0xf8] sm:$0xff] }
  0xd2   : > { %1871 = vmatpush1.bf16.msra.mxu1 %v1870_v20  ;;  %v2853_v20 = vld [vmem:[%s2601_s17 + $0xd8] sm:$0xff]  ;;  %v2861_v22 = vld [vmem:[%s2601_s17 + $0xe8] sm:$0xff]  ;;  %v2874_v25 = vld [vmem:[%s2601_s17 + $0xf0] sm:$0xff] }
  0xd3   : > { %1823 = vmatpush1.bf16.msra.mxu0 %v1822_v36  ;;  %1873 = vmatprep.subr.bf16.mxu1 %v1872_v21  ;;  %v2749_v36 = vld [vmem:[%s2601_s17 + $0x28] sm:$0xff]  ;;  %v2858_v21 = vld [vmem:[%s2601_s17 + $0xd0] sm:$0xff]  ;;  %v843_v32 = vld [vmem:[%s2622_s18 + $0x1f8] sm:$0xff] }
  0xd4   : > { %1825 = vmatprep.subr.bf16.mxu0 %v1824_v40  ;;  %v825_v40 = vld [vmem:[%s2622_s18 + $0x168] sm:$0xff] }
  0xd5   : > { %v1884_v46 = vpack.c.bf16 %v827_v41, %v825_v40  ;;  %v841_v31 = vld [vmem:[%s2622_s18 + $0x1e8] sm:$0xff]  ;;  %v546_v40 = vshrl.u32 %v545_v39, 7 }
  0xd6   : > { %1875 = vmatpush1.bf16.msra.mxu1 %v1874_v27  ;;  %v836_v27 = vld [vmem:[%s2622_s18 + $0x1c0] sm:$0xff]  ;;  %v1900_v33 = vpack.c.bf16 %v843_v32, %v841_v31 }
  0xd7   : > { %1827 = vmatpush1.bf16.msra.mxu0 %v1826_v49  ;;  %1877 = vmatprep.subr.bf16.mxu1 %v1876_v29  ;;  %v829_v49 = vld [vmem:[%s2622_s18 + $0x188] sm:$0xff]  ;;  %v838_v29 = vld [vmem:[%s2622_s18 + $0x1d0] sm:$0xff]  ;;  %v2883_v41 = vsub.s32 0, %v546_v40 }
  0xd8   : > { %1829 = vmatprep.subr.bf16.mxu0 %v1828_v53  ;;  %v2773_v53 = vld [vmem:[%s2601_s17 + $0x48] sm:$0xff]  ;;  %v1888_v54 = vpack.c.bf16 %v831_v50, %v829_v49  ;;  %v1898_v30 = vpack.c.bf16 %v838_v29, %v836_v27 }
  0xda   : > { %1879 = vmatpush1.bf16.msra.mxu1 %v1878_v35  ;;  %v840_v35 = vld [vmem:[%s2622_s18 + $0x1e0] sm:$0xff] }
  0xdb   : > { %1831 = vmatpush1.bf16.msra.mxu0 %v1830_v61  ;;  %1881 = vmatprep.subr.bf16.mxu1 %v1880_v37  ;;  %v2785_v61 = vld [vmem:[%s2601_s17 + $0x58] sm:$0xff]  ;;  %v842_v37 = vld [vmem:[%s2622_s18 + $0x1f0] sm:$0xff] }
  0xdc   : > { %1833 = vmatprep.subr.bf16.mxu0 %v1832_v1  ;;  %v837_v1 = vld [vmem:[%s2622_s18 + $0x1c8] sm:$0xff]  ;;  %v1902_v38 = vpack.c.bf16 %v842_v37, %v840_v35 }
  0xdd   : > { %v1896_v6 = vpack.c.bf16 %v839_v2, %v837_v1 }
  0xde   : > { %1883 = vmatpush1.bf16.msra.mxu1 %v1882_v44  ;;  %v543_v44 = vld [vmem:[%s407_s12] sm:$0x3] }
  0xdf   : > { %1835 = vmatpush1.bf16.msra.mxu0 %v1834_v9  ;;  %1885 = vmatprep.subr.bf16.mxu1 %v1884_v46  ;;  %v2810_v9 = vld [vmem:[%s2601_s17 + $0x70] sm:$0xff]  ;;  %v2890_v46 = vsub.s32 1, %v546_v40  ;;  %v2893_v47 = vrot.slane %v543_v44, %v2883_v41 }
  0xe0   : > { %1837 = vmatprep.subr.bf16.mxu0 %v1836_v12  ;;  %v2821_v12 = vld [vmem:[%s2601_s17 + $0x98] sm:$0xff] }
  0xe1   : > { %v2896_v48 = vrot.slane %v543_v44, %v2890_v46 }
  0xe2   : > { %1887 = vmatpush1.bf16.msra.mxu1 %v1886_v52 }
  0xe3   : > { %1839 = vmatpush1.bf16.msra.mxu0 %v1838_v19  ;;  %1889 = vmatprep.subr.bf16.mxu1 %v1888_v54  ;;  %v2850_v19 = vld [vmem:[%s2601_s17 + $0xc0] sm:$0xff] }
  0xe6   : > { %620 = vmatmul.mubr.f32.vlgmr.msra.gmra.mrb[0].mxu0 %v2734_v26  ;;  %1891 = vmatpush1.bf16.msra.mxu1 %v1890_v60 }
  0xe7   : > { %625 = vmatprep.mubr.f32.mxu0 %v2737_v28  ;;  %1893 = vmatprep.subr.bf16.mxu1 %v1892_v62 }
  0xea   : > { %626 = vmatmul.mubr.f32.gmra.mrb[2].mxu0 %v2746_v34  ;;  %1895 = vmatpush1.bf16.msra.mxu1 %v1894_v4 }
  0xeb   : > { %631 = vmatprep.mubr.f32.mxu0 %v2749_v36  ;;  %1897 = vmatprep.subr.bf16.mxu1 %v1896_v6 }
  0xee   : > { %632 = vmatmul.mubr.f32.gmra.mrb[4].mxu0 %v2758_v43  ;;  %1899 = vmatpush1.bf16.msra.mxu1 %v1898_v30 }
  0xef   : > { %637 = vmatprep.mubr.f32.mxu0 %v2761_v45  ;;  %1901 = vmatprep.subr.bf16.mxu1 %v1900_v33 }
  0xf2   : > { %638 = vmatmul.mubr.f32.gmra.mrb[6].mxu0 %v2770_v51  ;;  %1903 = vmatpush1.bf16.msra.mxu1 %v1902_v38 }
  0xf3   : > { %643 = vmatprep.mubr.f32.mxu0 %v2773_v53 }
  0xf6   : > { %644 = vmatmul.mubr.f32.gmra.mrb[8].mxu0 %v2782_v59 }
  0xf7   : > { %649 = vmatprep.mubr.f32.mxu0 %v2785_v61 }
  0xfa   : > { %650 = vmatmul.mubr.f32.gmra.mrb[10].mxu0 %v2794_v3 }
  0xfb   : > { %655 = vmatprep.mubr.f32.mxu0 %v2797_v5 }
  0xfe   : > { %656 = vmatmul.mubr.f32.gmra.mrb[12].mxu0 %v2802_v7 }
  0xff   : > { %661 = vmatprep.mubr.f32.mxu0 %v2805_v8 }
 0x102   : > { %662 = vmatmul.mubr.f32.gmra.mrb[14].mxu0 %v2810_v9 }
 0x103   : > { %667 = vmatprep.mubr.f32.mxu0 %v2813_v10 }
 0x106   : > { %668 = vmatmul.mubr.f32.gmra.mrb[16].mxu0 %v2818_v11 }
 0x107   : > { %673 = vmatprep.mubr.f32.mxu0 %v2821_v12 }
 0x10a   : > { %674 = vmatmul.mubr.f32.gmra.mrb[18].mxu0 %v2826_v13 }
 0x10b   : > { %679 = vmatprep.mubr.f32.mxu0 %v2829_v14 }
 0x10e   : > { %680 = vmatmul.mubr.f32.gmra.mrb[20].mxu0 %v2834_v15 }
 0x10f   : > { %685 = vmatprep.mubr.f32.mxu0 %v2837_v16 }
 0x112   : > { %686 = vmatmul.mubr.f32.gmra.mrb[22].mxu0 %v2842_v17 }
 0x113   : > { %691 = vmatprep.mubr.f32.mxu0 %v2845_v18 }
 0x116   : > { %692 = vmatmul.mubr.f32.gmra.mrb[24].mxu0 %v2850_v19 }
 0x117   : > { %697 = vmatprep.mubr.f32.mxu0 %v2853_v20 }
 0x11a   : > { %698 = vmatmul.mubr.f32.gmra.mrb[26].mxu0 %v2858_v21 }
 0x11b   : > { %703 = vmatprep.mubr.f32.mxu0 %v2861_v22 }
 0x11e   : > { %704 = vmatmul.mubr.f32.gmra.mrb[28].mxu0 %v2866_v23 }
 0x11f   : > { %709 = vmatprep.mubr.f32.mxu0 %v2869_v24 }
 0x122   : > { %710 = vmatmul.mubr.f32.gmra.mrb[30].mxu0 %v2874_v25 }
 0x1b9   : > { %v621_v49 = vpop.f32.mrb[0].mxu0 }
 0x1ba   : > { %v622_v50 = vadd.f32 %v621_v49, %v2893_v47  ;;  %v623_v52 = vpop.f32.mrb[1].mxu0 }
 0x1bb   : > { %v624_v54 = vadd.f32 %v623_v52, %v2896_v48 }
 0x1bc   : > { %v716_v57 = vmax.f32 %v622_v50, 0.0 }
 0x1bd   : > { %v627_v55 = vpop.f32.mrb[2].mxu0  ;;  %v717_v56 = vmax.f32 %v624_v54, 0.0 }
 0x1be   : > { %v628_v58 = vadd.f32 %v627_v55, %v2893_v47  ;;  %v629_v60 = vpop.f32.mrb[3].mxu0 }
 0x1bf   : > { %v630_v62 = vadd.f32 %v629_v60, %v2896_v48  ;;  %908 = vmatprep.mubr.f32.mxu1 %v717_v56 }
 0x1c0   : > { %909 = vmatmul.mubr.f32.vlgmr.msra.gmra.mrb[0].mxu1 %v716_v57  ;;  %v718_v1 = vmax.f32 %v628_v58, 0.0 }
 0x1c1   : > { %v719_v63 = vmax.f32 %v630_v62, 0.0  ;;  %v633_v0 = vpop.f32.mrb[4].mxu0 }
 0x1c2   : > { %v634_v2 = vadd.f32 %v633_v0, %v2893_v47  ;;  %v635_v4 = vpop.f32.mrb[5].mxu0 }
 0x1c3   : > { %v636_v6 = vadd.f32 %v635_v4, %v2896_v48  ;;  %914 = vmatprep.mubr.f32.mxu1 %v719_v63 }
 0x1c4   : > { %915 = vmatmul.mubr.f32.gmra.mrb[2].mxu1 %v718_v1  ;;  %v720_v30 = vmax.f32 %v634_v2, 0.0 }
 0x1c5   : > { %v721_v27 = vmax.f32 %v636_v6, 0.0  ;;  %v639_v29 = vpop.f32.mrb[6].mxu0 }
 0x1c6   : > { %v640_v31 = vadd.f32 %v639_v29, %v2893_v47  ;;  %v641_v32 = vpop.f32.mrb[7].mxu0 }
 0x1c7   : > { %v642_v33 = vadd.f32 %v641_v32, %v2896_v48  ;;  %920 = vmatprep.mubr.f32.mxu1 %v721_v27 }
 0x1c8   : > { %921 = vmatmul.mubr.f32.gmra.mrb[4].mxu1 %v720_v30  ;;  %v722_v38 = vmax.f32 %v640_v31, 0.0 }
 0x1c9   : > { %v723_v35 = vmax.f32 %v642_v33, 0.0  ;;  %v645_v37 = vpop.f32.mrb[8].mxu0 }
 0x1ca   : > { %v646_v39 = vadd.f32 %v645_v37, %v2893_v47  ;;  %v647_v40 = vpop.f32.mrb[9].mxu0 }
 0x1cb   : > { %v648_v44 = vadd.f32 %v647_v40, %v2896_v48  ;;  %926 = vmatprep.mubr.f32.mxu1 %v723_v35 }
 0x1cc   : > { %927 = vmatmul.mubr.f32.gmra.mrb[6].mxu1 %v722_v38  ;;  %v724_v52 = vmax.f32 %v646_v39, 0.0 }
 0x1cd   : > { %v725_v49 = vmax.f32 %v648_v44, 0.0  ;;  %v651_v50 = vpop.f32.mrb[10].mxu0 }
 0x1ce   : > { %v652_v54 = vadd.f32 %v651_v50, %v2893_v47  ;;  %v653_v55 = vpop.f32.mrb[11].mxu0 }
 0x1cf   : > { %v654_v56 = vadd.f32 %v653_v55, %v2896_v48  ;;  %932 = vmatprep.mubr.f32.mxu1 %v725_v49 }
 0x1d0   : > { %933 = vmatmul.mubr.f32.gmra.mrb[8].mxu1 %v724_v52  ;;  %v726_v60 = vmax.f32 %v652_v54, 0.0 }
 0x1d1   : > { %v727_v57 = vmax.f32 %v654_v56, 0.0  ;;  %v657_v58 = vpop.f32.mrb[12].mxu0 }
 0x1d2   : > { %v658_v62 = vadd.f32 %v657_v58, %v2893_v47  ;;  %v659_v63 = vpop.f32.mrb[13].mxu0 }
 0x1d3   : > { %v660_v0 = vadd.f32 %v659_v63, %v2896_v48  ;;  %938 = vmatprep.mubr.f32.mxu1 %v727_v57 }
 0x1d4   : > { %939 = vmatmul.mubr.f32.gmra.mrb[10].mxu1 %v726_v60  ;;  %v728_v4 = vmax.f32 %v658_v62, 0.0 }
 0x1d5   : > { %v729_v1 = vmax.f32 %v660_v0, 0.0  ;;  %v663_v2 = vpop.f32.mrb[14].mxu0 }
 0x1d6   : > { %v664_v6 = vadd.f32 %v663_v2, %v2893_v47  ;;  %v665_v27 = vpop.f32.mrb[15].mxu0 }
 0x1d7   : > { %v666_v29 = vadd.f32 %v665_v27, %v2896_v48  ;;  %944 = vmatprep.mubr.f32.mxu1 %v729_v1 }
 0x1d8   : > { %945 = vmatmul.mubr.f32.gmra.mrb[12].mxu1 %v728_v4  ;;  %v730_v32 = vmax.f32 %v664_v6, 0.0 }
 0x1d9   : > { %v731_v30 = vmax.f32 %v666_v29, 0.0  ;;  %v669_v31 = vpop.f32.mrb[16].mxu0 }
 0x1da   : > { %v670_v33 = vadd.f32 %v669_v31, %v2893_v47  ;;  %v671_v35 = vpop.f32.mrb[17].mxu0 }
 0x1db   : > { %v672_v37 = vadd.f32 %v671_v35, %v2896_v48  ;;  %950 = vmatprep.mubr.f32.mxu1 %v731_v30 }
 0x1dc   : > { %951 = vmatmul.mubr.f32.gmra.mrb[14].mxu1 %v730_v32  ;;  %v732_v40 = vmax.f32 %v670_v33, 0.0 }
 0x1dd   : > { %v733_v38 = vmax.f32 %v672_v37, 0.0  ;;  %v675_v39 = vpop.f32.mrb[18].mxu0 }
 0x1de   : > { %v676_v44 = vadd.f32 %v675_v39, %v2893_v47  ;;  %v677_v49 = vpop.f32.mrb[19].mxu0 }
 0x1df   : > { %v678_v50 = vadd.f32 %v677_v49, %v2896_v48  ;;  %956 = vmatprep.mubr.f32.mxu1 %v733_v38 }
 0x1e0   : > { %957 = vmatmul.mubr.f32.gmra.mrb[16].mxu1 %v732_v40  ;;  %v734_v55 = vmax.f32 %v676_v44, 0.0 }
 0x1e1   : > { %v735_v52 = vmax.f32 %v678_v50, 0.0  ;;  %v681_v54 = vpop.f32.mrb[20].mxu0 }
 0x1e2   : > { %v682_v56 = vadd.f32 %v681_v54, %v2893_v47  ;;  %v683_v57 = vpop.f32.mrb[21].mxu0 }
 0x1e3   : > { %v684_v58 = vadd.f32 %v683_v57, %v2896_v48  ;;  %962 = vmatprep.mubr.f32.mxu1 %v735_v52 }
 0x1e4   : > { %963 = vmatmul.mubr.f32.gmra.mrb[18].mxu1 %v734_v55  ;;  %v736_v63 = vmax.f32 %v682_v56, 0.0 }
 0x1e5   : > { %v737_v60 = vmax.f32 %v684_v58, 0.0  ;;  %v687_v62 = vpop.f32.mrb[22].mxu0 }
 0x1e6   : > { %v688_v0 = vadd.f32 %v687_v62, %v2893_v47  ;;  %v689_v1 = vpop.f32.mrb[23].mxu0 }
 0x1e7   : > { %v690_v2 = vadd.f32 %v689_v1, %v2896_v48  ;;  %968 = vmatprep.mubr.f32.mxu1 %v737_v60  ;;  %v748_v1 = vld [vmem:[#allocation2] sm:$0xff] }
 0x1e8   : > { %969 = vmatmul.mubr.f32.gmra.mrb[20].mxu1 %v736_v63  ;;  %v738_v27 = vmax.f32 %v688_v0, 0.0 }
 0x1e9   : > { %v739_v4 = vmax.f32 %v690_v2, 0.0  ;;  %v693_v6 = vpop.f32.mrb[24].mxu0  ;;  %v749_v2 = vld [vmem:[#allocation2 + $0x8] sm:$0xff] }
 0x1ea   : > { %v694_v29 = vadd.f32 %v693_v6, %v2893_v47  ;;  %v695_v30 = vpop.f32.mrb[25].mxu0 }
 0x1eb   : > { %v696_v31 = vadd.f32 %v695_v30, %v2896_v48  ;;  %974 = vmatprep.mubr.f32.mxu1 %v739_v4  ;;  %v750_v30 = vld [vmem:[#allocation2 + $0x10] sm:$0xff] }
 0x1ec   : > { %975 = vmatmul.mubr.f32.gmra.mrb[22].mxu1 %v738_v27  ;;  %v740_v35 = vmax.f32 %v694_v29, 0.0 }
 0x1ed   : > { %v741_v32 = vmax.f32 %v696_v31, 0.0  ;;  %v699_v33 = vpop.f32.mrb[26].mxu0  ;;  %v751_v31 = vld [vmem:[#allocation2 + $0x18] sm:$0xff] }
 0x1ee   : > { %v700_v37 = vadd.f32 %v699_v33, %v2893_v47  ;;  %v701_v38 = vpop.f32.mrb[27].mxu0 }
 0x1ef   : > { %v702_v39 = vadd.f32 %v701_v38, %v2896_v48  ;;  %980 = vmatprep.mubr.f32.mxu1 %v741_v32 }
 0x1f0   : > { %981 = vmatmul.mubr.f32.gmra.mrb[24].mxu1 %v740_v35  ;;  %v742_v49 = vmax.f32 %v700_v37, 0.0  ;;  %v752_v35 = vld [vmem:[#allocation2 + $0x20] sm:$0xff]  ;;  %v753_v37 = vld [vmem:[#allocation2 + $0x28] sm:$0xff] }
 0x1f1   : > { %v743_v40 = vmax.f32 %v702_v39, 0.0  ;;  %v705_v44 = vpop.f32.mrb[28].mxu0 }
 0x1f2   : > { %v706_v50 = vadd.f32 %v705_v44, %v2893_v47  ;;  %v707_v52 = vpop.f32.mrb[29].mxu0 }
 0x1f3   : > { %v708_v54 = vadd.f32 %v707_v52, %v2896_v48  ;;  %986 = vmatprep.mubr.f32.mxu1 %v743_v40 }
 0x1f4   : > { %987 = vmatmul.mubr.f32.gmra.mrb[26].mxu1 %v742_v49  ;;  %v744_v57 = vmax.f32 %v706_v50, 0.0  ;;  %v754_v49 = vld [vmem:[#allocation2 + $0x30] sm:$0xff]  ;;  %v755_v50 = vld [vmem:[#allocation2 + $0x38] sm:$0xff] }
 0x1f5   : > { %v745_v55 = vmax.f32 %v708_v54, 0.0  ;;  %v711_v56 = vpop.f32.mrb[30].mxu0 }
 0x1f6   : > { %v712_v58 = vadd.f32 %v711_v56, %v2893_v47  ;;  %v713_v60 = vpop.f32.mrb[31].mxu0 }
 0x1f7   : > { %v714_v62 = vadd.f32 %v713_v60, %v2896_v48  ;;  %992 = vmatprep.mubr.f32.mxu1 %v745_v55 }
 0x1f8   : > { %993 = vmatmul.mubr.f32.gmra.mrb[28].mxu1 %v744_v57  ;;  %v746_v0 = vmax.f32 %v712_v58, 0.0  ;;  %v756_v57 = vld [vmem:[#allocation2 + $0x40] sm:$0xff]  ;;  %v757_v58 = vld [vmem:[#allocation2 + $0x48] sm:$0xff] }
 0x1f9   : > { %v747_v63 = vmax.f32 %v714_v62, 0.0 }
 0x1fb   : > { %998 = vmatprep.mubr.f32.mxu1 %v747_v63 }
 0x1fc   : > { %999 = vmatmul.mubr.f32.gmra.mrb[30].mxu1 %v746_v0 }
 0x293   : > { %v910_v4 = vpop.f32.mrb[0].mxu1 }
 0x294   : > { %v1005_v6 = vadd.f32 %v910_v4, %v748_v1  ;;  %v912_v27 = vpop.f32.mrb[1].mxu1  ;;  %v758_v1 = vld [vmem:[#allocation2 + $0x50] sm:$0xff] }
 0x295   : > { %v1006_v29 = vadd.f32 %v912_v27, %v749_v2  ;;  %v759_v2 = vld [vmem:[#allocation2 + $0x58] sm:$0xff] }
 0x296   : > { %1037 = vst [vmem:[#allocation2] sm:$0xff] %v1005_v6 }
 0x297   : > { %1038 = vst [vmem:[#allocation2 + $0x8] sm:$0xff] %v1006_v29  ;;  %v916_v47 = vpop.f32.mrb[2].mxu1 }
 0x298   : > { %v1007_v32 = vadd.f32 %v916_v47, %v750_v30  ;;  %v918_v33 = vpop.f32.mrb[3].mxu1  ;;  %v760_v30 = vld [vmem:[#allocation2 + $0x60] sm:$0xff] }
 0x299   : > { %v1008_v48 = vadd.f32 %v918_v33, %v751_v31  ;;  %v761_v31 = vld [vmem:[#allocation2 + $0x68] sm:$0xff] }
 0x29a   : > { %1039 = vst [vmem:[#allocation2 + $0x10] sm:$0xff] %v1007_v32 }
 0x29b   : > { %1040 = vst [vmem:[#allocation2 + $0x18] sm:$0xff] %v1008_v48  ;;  %v922_v38 = vpop.f32.mrb[4].mxu1 }
 0x29c   : > { %v1009_v39 = vadd.f32 %v922_v38, %v752_v35  ;;  %v924_v40 = vpop.f32.mrb[5].mxu1  ;;  %v762_v35 = vld [vmem:[#allocation2 + $0x70] sm:$0xff] }
 0x29d   : > { %v1010_v44 = vadd.f32 %v924_v40, %v753_v37  ;;  %v763_v37 = vld [vmem:[#allocation2 + $0x78] sm:$0xff] }
 0x29e   : > { %1041 = vst [vmem:[#allocation2 + $0x20] sm:$0xff] %v1009_v39 }
 0x29f   : > { %1042 = vst [vmem:[#allocation2 + $0x28] sm:$0xff] %v1010_v44  ;;  %v928_v52 = vpop.f32.mrb[6].mxu1 }
 0x2a0   : > { %v1011_v54 = vadd.f32 %v928_v52, %v754_v49  ;;  %v930_v55 = vpop.f32.mrb[7].mxu1  ;;  %v764_v49 = vld [vmem:[#allocation2 + $0x80] sm:$0xff] }
 0x2a1   : > { %v1012_v56 = vadd.f32 %v930_v55, %v755_v50  ;;  %v765_v50 = vld [vmem:[#allocation2 + $0x88] sm:$0xff] }
 0x2a2   : > { %1043 = vst [vmem:[#allocation2 + $0x30] sm:$0xff] %v1011_v54 }
 0x2a3   : > { %1044 = vst [vmem:[#allocation2 + $0x38] sm:$0xff] %v1012_v56  ;;  %v934_v60 = vpop.f32.mrb[8].mxu1 }
 0x2a4   : > { %v1013_v62 = vadd.f32 %v934_v60, %v756_v57  ;;  %v936_v63 = vpop.f32.mrb[9].mxu1  ;;  %v766_v57 = vld [vmem:[#allocation2 + $0x90] sm:$0xff] }
 0x2a5   : > { %v1014_v0 = vadd.f32 %v936_v63, %v757_v58  ;;  %v767_v58 = vld [vmem:[#allocation2 + $0x98] sm:$0xff] }
 0x2a6   : > { %1045 = vst [vmem:[#allocation2 + $0x40] sm:$0xff] %v1013_v62 }
 0x2a7   : > { %1046 = vst [vmem:[#allocation2 + $0x48] sm:$0xff] %v1014_v0  ;;  %v940_v4 = vpop.f32.mrb[10].mxu1 }
 0x2a8   : > { %v1015_v6 = vadd.f32 %v940_v4, %v758_v1  ;;  %v942_v27 = vpop.f32.mrb[11].mxu1  ;;  %v768_v1 = vld [vmem:[#allocation2 + $0xa0] sm:$0xff] }
 0x2a9   : > { %v1016_v29 = vadd.f32 %v942_v27, %v759_v2  ;;  %v769_v2 = vld [vmem:[#allocation2 + $0xa8] sm:$0xff] }
 0x2aa   : > { %1047 = vst [vmem:[#allocation2 + $0x50] sm:$0xff] %v1015_v6 }
 0x2ab   : > { %1048 = vst [vmem:[#allocation2 + $0x58] sm:$0xff] %v1016_v29  ;;  %v946_v47 = vpop.f32.mrb[12].mxu1 }
 0x2ac   : > { %v1017_v32 = vadd.f32 %v946_v47, %v760_v30  ;;  %v948_v33 = vpop.f32.mrb[13].mxu1  ;;  %v770_v30 = vld [vmem:[#allocation2 + $0xb0] sm:$0xff] }
 0x2ad   : > { %v1018_v48 = vadd.f32 %v948_v33, %v761_v31  ;;  %v771_v31 = vld [vmem:[#allocation2 + $0xb8] sm:$0xff] }
 0x2ae   : > { %1049 = vst [vmem:[#allocation2 + $0x60] sm:$0xff] %v1017_v32 }
 0x2af   : > { %1050 = vst [vmem:[#allocation2 + $0x68] sm:$0xff] %v1018_v48  ;;  %v952_v38 = vpop.f32.mrb[14].mxu1 }
 0x2b0   : > { %v1019_v39 = vadd.f32 %v952_v38, %v762_v35  ;;  %v954_v40 = vpop.f32.mrb[15].mxu1  ;;  %v772_v35 = vld [vmem:[#allocation2 + $0xc0] sm:$0xff] }
 0x2b1   : > { %v1020_v44 = vadd.f32 %v954_v40, %v763_v37  ;;  %v773_v37 = vld [vmem:[#allocation2 + $0xc8] sm:$0xff] }
 0x2b2   : > { %1051 = vst [vmem:[#allocation2 + $0x70] sm:$0xff] %v1019_v39 }
 0x2b3   : > { %1052 = vst [vmem:[#allocation2 + $0x78] sm:$0xff] %v1020_v44  ;;  %v958_v52 = vpop.f32.mrb[16].mxu1 }
 0x2b4   : > { %v1021_v54 = vadd.f32 %v958_v52, %v764_v49  ;;  %v960_v55 = vpop.f32.mrb[17].mxu1  ;;  %v774_v49 = vld [vmem:[#allocation2 + $0xd0] sm:$0xff] }
 0x2b5   : > { %v1022_v56 = vadd.f32 %v960_v55, %v765_v50  ;;  %v775_v50 = vld [vmem:[#allocation2 + $0xd8] sm:$0xff] }
 0x2b6   : > { %1053 = vst [vmem:[#allocation2 + $0x80] sm:$0xff] %v1021_v54 }
 0x2b7   : > { %1054 = vst [vmem:[#allocation2 + $0x88] sm:$0xff] %v1022_v56  ;;  %v964_v60 = vpop.f32.mrb[18].mxu1 }
 0x2b8   : > { %v1023_v62 = vadd.f32 %v964_v60, %v766_v57  ;;  %v966_v63 = vpop.f32.mrb[19].mxu1  ;;  %v776_v57 = vld [vmem:[#allocation2 + $0xe0] sm:$0xff] }
 0x2b9   : > { %v1024_v0 = vadd.f32 %v966_v63, %v767_v58  ;;  %v777_v58 = vld [vmem:[#allocation2 + $0xe8] sm:$0xff] }
 0x2ba   : > { %1055 = vst [vmem:[#allocation2 + $0x90] sm:$0xff] %v1023_v62 }
 0x2bb   : > { %1056 = vst [vmem:[#allocation2 + $0x98] sm:$0xff] %v1024_v0  ;;  %v970_v4 = vpop.f32.mrb[20].mxu1 }
 0x2bc   : > { %v1025_v6 = vadd.f32 %v970_v4, %v768_v1  ;;  %v972_v27 = vpop.f32.mrb[21].mxu1  ;;  %v778_v1 = vld [vmem:[#allocation2 + $0xf0] sm:$0xff] }
 0x2bd   : > { %v1026_v29 = vadd.f32 %v972_v27, %v769_v2  ;;  %v779_v2 = vld [vmem:[#allocation2 + $0xf8] sm:$0xff] }
 0x2be   : > { %1057 = vst [vmem:[#allocation2 + $0xa0] sm:$0xff] %v1025_v6 }
 0x2bf   : > { %1058 = vst [vmem:[#allocation2 + $0xa8] sm:$0xff] %v1026_v29  ;;  %v976_v47 = vpop.f32.mrb[22].mxu1 }
 0x2c0   : > { %v1027_v32 = vadd.f32 %v976_v47, %v770_v30  ;;  %v978_v33 = vpop.f32.mrb[23].mxu1 }
 0x2c1   : > { %v1028_v48 = vadd.f32 %v978_v33, %v771_v31 }
 0x2c2   : > { %1059 = vst [vmem:[#allocation2 + $0xb0] sm:$0xff] %v1027_v32 }
 0x2c3   : > { %1060 = vst [vmem:[#allocation2 + $0xb8] sm:$0xff] %v1028_v48  ;;  %v982_v38 = vpop.f32.mrb[24].mxu1 }
 0x2c4   : > { %v1029_v39 = vadd.f32 %v982_v38, %v772_v35  ;;  %v984_v40 = vpop.f32.mrb[25].mxu1 }
 0x2c5   : > { %v1030_v44 = vadd.f32 %v984_v40, %v773_v37 }
 0x2c6   : > { %1061 = vst [vmem:[#allocation2 + $0xc0] sm:$0xff] %v1029_v39 }
 0x2c7   : > { %1062 = vst [vmem:[#allocation2 + $0xc8] sm:$0xff] %v1030_v44  ;;  %v988_v52 = vpop.f32.mrb[26].mxu1 }
 0x2c8   : > { %v1031_v54 = vadd.f32 %v988_v52, %v774_v49  ;;  %v990_v55 = vpop.f32.mrb[27].mxu1 }
 0x2c9   : > { %v1032_v56 = vadd.f32 %v990_v55, %v775_v50 }
 0x2ca   : > { %1063 = vst [vmem:[#allocation2 + $0xd0] sm:$0xff] %v1031_v54 }
 0x2cb   : > { %1064 = vst [vmem:[#allocation2 + $0xd8] sm:$0xff] %v1032_v56  ;;  %v994_v60 = vpop.f32.mrb[28].mxu1 }
 0x2cc   : > { %v1033_v62 = vadd.f32 %v994_v60, %v776_v57  ;;  %v996_v63 = vpop.f32.mrb[29].mxu1 }
 0x2cd   : > { %v1034_v0 = vadd.f32 %v996_v63, %v777_v58  ;;  %1072 = sbr.rel (%p1762_p2) target bundleno = 976 (0x3d0), region = 68 }
 0x2ce   : > { %1065 = vst [vmem:[#allocation2 + $0xe0] sm:$0xff] %v1033_v62 }
 0x2cf   : > { %1066 = vst [vmem:[#allocation2 + $0xe8] sm:$0xff] %v1034_v0  ;;  %v1000_v4 = vpop.f32.mrb[30].mxu1 }
 0x2d0   : > { %v1035_v6 = vadd.f32 %v1000_v4, %v778_v1  ;;  %v1002_v27 = vpop.f32.mrb[31].mxu1 }
 0x2d1   : > { %v1036_v29 = vadd.f32 %v1002_v27, %v779_v2 }
 0x2d2   : > { %1067 = vst [vmem:[#allocation2 + $0xf0] sm:$0xff] %v1035_v6 }
 0x2d3   : > { %1068 = vst [vmem:[#allocation2 + $0xf8] sm:$0xff] %v1036_v29 }
 0x2d4   : > { %v1077_v30 = vld [vmem:[#allocation2 + $0x20] sm:$0xff]  ;;  %v1078_v31 = vld [vmem:[#allocation2 + $0x28] sm:$0xff]  ;;  %s3643_s22 = sld [smem:[#allocation34_spill]]  ;;  %v1079_v37 = vld [vmem:[#allocation2 + $0x30] sm:$0xff]  ;;  %s3652_s19 = sld [smem:[#allocation35_spill]] }
 0x2d5   : > { %v1073_v48 = vld [vmem:[#allocation2] sm:$0xff]  ;;  %v1074_v35 = vld [vmem:[#allocation2 + $0x8] sm:$0xff]  ;;  %v1080_v38 = vld [vmem:[#allocation2 + $0x38] sm:$0xff]  ;;  %s3653_s15 = sld [smem:[#allocation36_spill]] }
 0x2d6   : > { %v1075_v39 = vld [vmem:[#allocation2 + $0x10] sm:$0xff]  ;;  %v1076_v40 = vld [vmem:[#allocation2 + $0x18] sm:$0xff]  ;;  %v1081_v2 = vld [vmem:[#allocation2 + $0x40] sm:$0xff] }
 0x2d7   : > { %v1083_v58 = vld [vmem:[#allocation2 + $0x50] sm:$0xff]  ;;  %v1084_v60 = vld [vmem:[#allocation2 + $0x58] sm:$0xff]  ;;  %v1082_v4 = vld [vmem:[#allocation2 + $0x48] sm:$0xff] }
 0x2d8   : > { %v1087_v29 = vld [vmem:[#allocation2 + $0x70] sm:$0xff] }
 0x2da   : > { %v1105_v47 = vld [vmem:[%s3643_s22] sm:$0x3] }
 0x2db   : > { %v2935_v32 = vrot.slane %v1105_v47, %v2883_v41  ;;  %v2938_v33 = vrot.slane %v1105_v47, %v2890_v46 }
 0x2dd   : > { %v1121_v44 = vadd.f32 %v2935_v32, %v1077_v30  ;;  %v1122_v49 = vadd.f32 %v2938_v33, %v1078_v31  ;;  %v1117_v50 = vadd.f32 %v2935_v32, %v1073_v48  ;;  %v1118_v52 = vadd.f32 %v2938_v33, %v1074_v35  ;;  %v1088_v31 = vld [vmem:[#allocation2 + $0x78] sm:$0xff]  ;;  %v1086_v35 = vld [vmem:[#allocation2 + $0x68] sm:$0xff] }
 0x2de   : > { %v1123_v54 = vadd.f32 %v2935_v32, %v1079_v37  ;;  %v1124_v55 = vadd.f32 %v2938_v33, %v1080_v38  ;;  %v1119_v56 = vadd.f32 %v2935_v32, %v1075_v39  ;;  %v1120_v57 = vadd.f32 %v2938_v33, %v1076_v40  ;;  %v1091_v37 = vld [vmem:[#allocation2 + $0x90] sm:$0xff] }
 0x2df   : > { %v2949_v62 = vadd.f32 %v1121_v44, %v2758_v43  ;;  %v2952_v63 = vadd.f32 %v1122_v49, %v2749_v36  ;;  %v2955_v0 = vadd.f32 %v1117_v50, %v2734_v26  ;;  %v2958_v1 = vadd.f32 %v1118_v52, %v2656_v42  ;;  %v1092_v44 = vld [vmem:[#allocation2 + $0x98] sm:$0xff] }
 0x2e0   : > { %v2961_v6 = vadd.f32 %v1123_v54, %v2770_v51  ;;  %v2964_v27 = vadd.f32 %v1124_v55, %v2761_v45  ;;  %v2967_v43 = vadd.f32 %v1119_v56, %v2746_v34  ;;  %v2970_v36 = vadd.f32 %v1120_v57, %v2737_v28  ;;  %v1085_v45 = vld [vmem:[#allocation2 + $0x60] sm:$0xff]  ;;  %v1090_v57 = vld [vmem:[#allocation2 + $0x88] sm:$0xff] }
 0x2e1   : > { %v1187_v26 = vadd.f32 %v2952_v63, %v2949_v62  ;;  %v1181_v42 = vadd.f32 %v2958_v1, %v2955_v0  ;;  %v1127_v30 = vadd.f32 %v2935_v32, %v1083_v58  ;;  %v1128_v51 = vadd.f32 %v2938_v33, %v1084_v60  ;;  %v1089_v55 = vld [vmem:[#allocation2 + $0x80] sm:$0xff] }
 0x2e2   : > { %v1190_v34 = vadd.f32 %v2964_v27, %v2961_v6  ;;  %v1184_v28 = vadd.f32 %v2970_v36, %v2967_v43  ;;  %v1125_v47 = vadd.f32 %v2935_v32, %v1081_v2  ;;  %v1126_v48 = vadd.f32 %v2938_v33, %v1082_v4  ;;  %v1095_v2 = vld [vmem:[#allocation2 + $0xb0] sm:$0xff]  ;;  %v1096_v4 = vld [vmem:[#allocation2 + $0xb8] sm:$0xff] }
 0x2e3   : > { %1188 = vadd.xlane.f32.xlu1 %v1187_v26  ;;  %1182 = vadd.xlane.f32.xlu0 %v1181_v42  ;;  %v2985_v38 = vadd.f32 %v1127_v30, %v2794_v3  ;;  %v2988_v39 = vadd.f32 %v1128_v51, %v2785_v61  ;;  %v1131_v40 = vadd.f32 %v2935_v32, %v1087_v29  ;;  %v1093_v30 = vld [vmem:[#allocation2 + $0xa0] sm:$0xff] }
 0x2e4   : > { %v2992_v49 = vadd.f32 %v1125_v47, %v2782_v59  ;;  %v2995_v50 = vadd.f32 %v1126_v48, %v2773_v53  ;;  %v1132_v52 = vadd.f32 %v2938_v33, %v1088_v31  ;;  %v1129_v54 = vadd.f32 %v2935_v32, %v1085_v45  ;;  %v1099_v47 = vld [vmem:[#allocation2 + $0xd0] sm:$0xff] }
 0x2e5   : > { %v1196_v3 = vadd.f32 %v2988_v39, %v2985_v38  ;;  %v1130_v61 = vadd.f32 %v2938_v33, %v1086_v35  ;;  %v1135_v56 = vadd.f32 %v2935_v32, %v1091_v37  ;;  %v3006_v58 = vadd.f32 %v1131_v40, %v2810_v9  ;;  %v1094_v9 = vld [vmem:[#allocation2 + $0xa8] sm:$0xff]  ;;  %v1100_v37 = vld [vmem:[#allocation2 + $0xd8] sm:$0xff]  ;;  %v1097_v40 = vld [vmem:[#allocation2 + $0xc0] sm:$0xff] }
 0x2e6   : > { %v1193_v59 = vadd.f32 %v2995_v50, %v2992_v49  ;;  %v3009_v53 = vadd.f32 %v1132_v52, %v2805_v8  ;;  %v1136_v60 = vadd.f32 %v2938_v33, %v1092_v44  ;;  %v3013_v29 = vadd.f32 %v1129_v54, %v2802_v7 }
 0x2e7   : > { %1191 = vadd.xlane.f32.xlu1 %v1190_v34  ;;  %1185 = vadd.xlane.f32.xlu0 %v1184_v28  ;;  %v3016_v26 = vadd.f32 %v1130_v61, %v2797_v5  ;;  %v1133_v42 = vadd.f32 %v2935_v32, %v1089_v55  ;;  %v1134_v51 = vadd.f32 %v2938_v33, %v1090_v57  ;;  %v1103_v61 = vld [vmem:[#allocation2 + $0xf0] sm:$0xff]  ;;  %v1101_v57 = vld [vmem:[#allocation2 + $0xe0] sm:$0xff] }
 0x2e8   : > { %v3021_v8 = vadd.f32 %v1135_v56, %v2826_v13  ;;  %v1139_v31 = vadd.f32 %v2935_v32, %v1095_v2  ;;  %v1140_v45 = vadd.f32 %v2938_v33, %v1096_v4  ;;  %v1202_v7 = vadd.f32 %v3009_v53, %v3006_v58 }
 0x2e9   : > { %v3028_v34 = vadd.f32 %v1136_v60, %v2821_v12  ;;  %v1137_v5 = vadd.f32 %v2935_v32, %v1093_v30  ;;  %v1138_v28 = vadd.f32 %v2938_v33, %v1094_v9  ;;  %v1199_v13 = vadd.f32 %v3016_v26, %v3013_v29  ;;  %v1098_v12 = vld [vmem:[#allocation2 + $0xc8] sm:$0xff] }
 0x2ea   : > { %v3035_v48 = vadd.f32 %v1133_v42, %v2818_v11  ;;  %v3038_v35 = vadd.f32 %v1134_v51, %v2813_v10  ;;  %v3041_v44 = vadd.f32 %v1139_v31, %v2842_v17  ;;  %v3044_v52 = vadd.f32 %v1140_v45, %v2837_v16 }
 0x2eb   : > { %1197 = vadd.xlane.f32.xlu1 %v1196_v3  ;;  %1194 = vadd.xlane.f32.xlu0 %v1193_v59  ;;  %v1143_v54 = vadd.f32 %v2935_v32, %v1099_v47  ;;  %v3048_v55 = vadd.f32 %v1137_v5, %v2834_v15  ;;  %v3051_v11 = vadd.f32 %v1138_v28, %v2829_v14  ;;  %v1104_v15 = vld [vmem:[#allocation2 + $0xf8] sm:$0xff]  ;;  %v1102_v59 = vld [vmem:[#allocation2 + $0xe8] sm:$0xff] }
 0x2ec   : > { %v1144_v10 = vadd.f32 %v2938_v33, %v1100_v37  ;;  %v1141_v3 = vadd.f32 %v2935_v32, %v1097_v40  ;;  %v1208_v17 = vadd.f32 %v3028_v34, %v3021_v8  ;;  %v1205_v16 = vadd.f32 %v3038_v35, %v3035_v48 }
 0x2ed   : > { %v1142_v56 = vadd.f32 %v2938_v33, %v1098_v12  ;;  %v1214_v14 = vadd.f32 %v3044_v52, %v3041_v44  ;;  %v3063_v60 = vadd.f32 %v1143_v54, %v2858_v21  ;;  %v1147_v2 = vadd.f32 %v2935_v32, %v1103_v61 }
 0x2ee   : > { %v1211_v4 = vadd.f32 %v3051_v11, %v3048_v55  ;;  %v3069_v42 = vadd.f32 %v1144_v10, %v2853_v20  ;;  %v3072_v30 = vadd.f32 %v1141_v3, %v2850_v19  ;;  %v1148_v9 = vadd.f32 %v2938_v33, %v1104_v15 }
 0x2ef   : > { %1203 = vadd.xlane.f32.xlu1 %v1202_v7  ;;  %1200 = vadd.xlane.f32.xlu0 %v1199_v13  ;;  %3644 = vst [vmem:[#allocation21_spill] sm:$0xff] %v3063_v60  ;;  %v3076_v51 = vadd.f32 %v1142_v56, %v2845_v18  ;;  %v1145_v21 = vadd.f32 %v2935_v32, %v1101_v57 }
 0x2f0   : > { %3645 = vst [vmem:[#allocation22_spill] sm:$0xff] %v3069_v42  ;;  %3646 = vst [vmem:[#allocation23_spill] sm:$0xff] %v3072_v30  ;;  %v1146_v31 = vadd.f32 %v2938_v33, %v1102_v59  ;;  %v1220_v45 = vadd.f32 %v3069_v42, %v3063_v60  ;;  %v3083_v20 = vadd.f32 %v1147_v2, %v2874_v25 }
 0x2f1   : > { %3647 = vst [vmem:[#allocation24_spill] sm:$0xff] %v3076_v51  ;;  %v3086_v19 = vadd.f32 %v1148_v9, %v2869_v24  ;;  %v1217_v7 = vadd.f32 %v3076_v51, %v3072_v30  ;;  %v3091_v18 = vadd.f32 %v1145_v21, %v2866_v23  ;;  %v1231_v33 = vmul.f32 %v2967_v43, %v2967_v43 }
 0x2f2   : > { %3648 = vst [vmem:[#allocation25_spill] sm:$0xff] %v3083_v20  ;;  %v3094_v32 = vadd.f32 %v1146_v31, %v2861_v22  ;;  %v1232_v25 = vmul.f32 %v2970_v36, %v2970_v36  ;;  %v1229_v24 = vmul.f32 %v2955_v0, %v2955_v0  ;;  %v1230_v22 = vmul.f32 %v2958_v1, %v2958_v1 }
 0x2f3   : > { %1209 = vadd.xlane.f32.xlu1 %v1208_v17  ;;  %1206 = vadd.xlane.f32.xlu0 %v1205_v16  ;;  %3649 = vst [vmem:[#allocation26_spill] sm:$0xff] %v3086_v19  ;;  %3650 = vst [vmem:[#allocation27_spill] sm:$0xff] %v3091_v18  ;;  %v1226_v5 = vadd.f32 %v3086_v19, %v3083_v20  ;;  %v1235_v47 = vmul.f32 %v2961_v6, %v2961_v6 }
 0x2f4   : > { %3651 = vst [vmem:[#allocation28_spill] sm:$0xff] %v3094_v32  ;;  %v1223_v23 = vadd.f32 %v3094_v32, %v3091_v18  ;;  %v1264_v28 = vadd.f32 %v1232_v25, %v1231_v33  ;;  %v1236_v13 = vmul.f32 %v2964_v27, %v2964_v27  ;;  %v1261_v37 = vadd.f32 %v1230_v22, %v1229_v24 }
 0x2f5   : > { %v1233_v40 = vmul.f32 %v2949_v62, %v2949_v62  ;;  %v1234_v12 = vmul.f32 %v2952_v63, %v2952_v63  ;;  %v1239_v10 = vmul.f32 %v2985_v38, %v2985_v38  ;;  %v1240_v3 = vmul.f32 %v2988_v39, %v2988_v39 }
 0x2f6   : > { %v1270_v54 = vadd.f32 %v1236_v13, %v1235_v47  ;;  %v1237_v17 = vmul.f32 %v2992_v49, %v2992_v49  ;;  %v1238_v16 = vmul.f32 %v2995_v50, %v2995_v50  ;;  %v1243_v56 = vmul.f32 %v3006_v58, %v3006_v58 }
 0x2f7   : > { %1215 = vadd.xlane.f32.xlu1 %v1214_v14  ;;  %1212 = vadd.xlane.f32.xlu0 %v1211_v4  ;;  %v1267_v61 = vadd.f32 %v1234_v12, %v1233_v40  ;;  %v1244_v15 = vmul.f32 %v3009_v53, %v3009_v53  ;;  %v1241_v57 = vmul.f32 %v3013_v29, %v3013_v29 }
 0x2f8   : > { %v1276_v59 = vadd.f32 %v1240_v3, %v1239_v10  ;;  %v1273_v14 = vadd.f32 %v1238_v16, %v1237_v17  ;;  %v1242_v2 = vmul.f32 %v3016_v26, %v3016_v26  ;;  %v1247_v9 = vmul.f32 %v3021_v8, %v3021_v8 }
 0x2f9   : > { %v1282_v4 = vadd.f32 %v1244_v15, %v1243_v56  ;;  %v1248_v21 = vmul.f32 %v3028_v34, %v3028_v34  ;;  %v1251_v25 = vmul.f32 %v3041_v44, %v3041_v44  ;;  %v1252_v24 = vmul.f32 %v3044_v52, %v3044_v52 }
 0x2fa   : > { %v1279_v31 = vadd.f32 %v1242_v2, %v1241_v57  ;;  %v1250_v22 = vmul.f32 %v3051_v11, %v3051_v11  ;;  %v1255_v47 = vmul.f32 %v3063_v60, %v3063_v60  ;;  %v1256_v13 = vmul.f32 %v3069_v42, %v3069_v42 }
 0x2fb   : > { %1221 = vadd.xlane.f32.xlu1 %v1220_v45  ;;  %1218 = vadd.xlane.f32.xlu0 %v1217_v7  ;;  %v1245_v45 = vmul.f32 %v3035_v48, %v3035_v48  ;;  %v1246_v7 = vmul.f32 %v3038_v35, %v3038_v35  ;;  %v1288_v33 = vadd.f32 %v1248_v21, %v1247_v9 }
 0x2fc   : > { %v1253_v40 = vmul.f32 %v3072_v30, %v3072_v30  ;;  %v1254_v12 = vmul.f32 %v3076_v51, %v3076_v51  ;;  %v1259_v10 = vmul.f32 %v3083_v20, %v3083_v20  ;;  %v1260_v3 = vmul.f32 %v3086_v19, %v3086_v19 }
 0x2fd   : > { %v1257_v17 = vmul.f32 %v3091_v18, %v3091_v18  ;;  %v1258_v16 = vmul.f32 %v3094_v32, %v3094_v32 }
 0x2fe   : > { %v1306_v56 = vadd.f32 %v1260_v3, %v1259_v10 }
 0x2ff   : > { %1227 = vadd.xlane.f32.xlu1 %v1226_v5  ;;  %1224 = vadd.xlane.f32.xlu0 %v1223_v23  ;;  %v1285_v5 = vadd.f32 %v1246_v7, %v1245_v45  ;;  %v1249_v23 = vmul.f32 %v3048_v55, %v3048_v55  ;;  %v1303_v15 = vadd.f32 %v1258_v16, %v1257_v17 }
 0x303   : > { %1265 = vadd.xlane.f32.xlu1 %v1264_v28  ;;  %1262 = vadd.xlane.f32.xlu0 %v1261_v37  ;;  %v1294_v28 = vadd.f32 %v1252_v24, %v1251_v25  ;;  %v1291_v37 = vadd.f32 %v1250_v22, %v1249_v23 }
 0x307   : > { %1271 = vadd.xlane.f32.xlu1 %v1270_v54  ;;  %1268 = vadd.xlane.f32.xlu0 %v1267_v61  ;;  %v1300_v54 = vadd.f32 %v1256_v13, %v1255_v47  ;;  %v1297_v61 = vadd.f32 %v1254_v12, %v1253_v40  ;;  %v1513_v47 = vld [vmem:[%s3653_s15] sm:$0x3] }
 0x308   : > { %v3199_v3 = vrot.slane %v1513_v47, %v2883_v41 }
 0x30b   : > { %1277 = vadd.xlane.f32.xlu1 %v1276_v59  ;;  %1274 = vadd.xlane.f32.xlu0 %v1273_v14 }
 0x30f   : > { %1283 = vadd.xlane.f32.xlu1 %v1282_v4  ;;  %1280 = vadd.xlane.f32.xlu0 %v1279_v31 }
 0x313   : > { %1289 = vadd.xlane.f32.xlu1 %v1288_v33  ;;  %1286 = vadd.xlane.f32.xlu0 %v1285_v5 }
 0x317   : > { %1295 = vadd.xlane.f32.xlu1 %v1294_v28  ;;  %1292 = vadd.xlane.f32.xlu0 %v1291_v37  ;;  %v1469_v28 = vld [vmem:[%s3652_s19] sm:$0x3] }
 0x318   : > { %v3196_v10 = vrot.slane %v1469_v28, %v2890_v46 }
 0x31b   : > { %1301 = vadd.xlane.f32.xlu1 %v1300_v54  ;;  %1298 = vadd.xlane.f32.xlu0 %v1297_v61  ;;  %v3193_v54 = vrot.slane %v1469_v28, %v2883_v41  ;;  %v3202_v61 = vrot.slane %v1513_v47, %v2890_v46 }
 0x31f   : > { %1307 = vadd.xlane.f32.xlu1 %v1306_v56  ;;  %1304 = vadd.xlane.f32.xlu0 %v1303_v15 }
 0x370   : > { %v1189_v57 = vpop.xlane.xlu1 %1188  ;;  %v1183_v59 = vpop.xlane.xlu0 %1182 }
 0x371   : > { %v3174_v23 = vmul.f32 0.00390625, %v1189_v57  ;;  %v3176_v22 = vmul.f32 0.00390625, %v1183_v59 }
 0x373   : > { %v1341_v46 = vmul.f32 %v3176_v22, %v3176_v22 }
 0x374   : > { %v1192_v14 = vpop.xlane.xlu1 %1191  ;;  %v1186_v2 = vpop.xlane.xlu0 %1185 }
 0x375   : > { %v3188_v40 = vmul.f32 0.00390625, %v1192_v14  ;;  %v3190_v12 = vmul.f32 0.00390625, %v1186_v2  ;;  %v1343_v2 = vmul.f32 %v3174_v23, %v3174_v23 }
 0x377   : > { %v1344_v18 = vmul.f32 %v3188_v40, %v3188_v40 }
 0x378   : > { %v1198_v4 = vpop.xlane.xlu1 %1197  ;;  %v1195_v9 = vpop.xlane.xlu0 %1194 }
 0x379   : > { %v3210_v15 = vmul.f32 0.00390625, %v1198_v4  ;;  %v3214_v59 = vmul.f32 0.00390625, %v1195_v9  ;;  %v1342_v4 = vmul.f32 %v3190_v12, %v3190_v12 }
 0x37b   : > { %v1345_v9 = vmul.f32 %v3214_v59, %v3214_v59 }
 0x37c   : > { %v1204_v21 = vpop.xlane.xlu1 %1203  ;;  %v1201_v31 = vpop.xlane.xlu0 %1200 }
 0x37d   : > { %v3230_v56 = vmul.f32 0.00390625, %v1204_v21  ;;  %v3242_v57 = vmul.f32 0.00390625, %v1201_v31 }
 0x380   : > { %v1210_v45 = vpop.xlane.xlu1 %1209  ;;  %v3164_v7 = vpop.xlane.xlu0 %1206 }
 0x384   : > { %v3166_v33 = vpop.xlane.xlu1 %1215  ;;  %v3168_v25 = vpop.xlane.xlu0 %1212 }
 0x388   : > { %v3170_v24 = vpop.xlane.xlu1 %1221  ;;  %v3172_v5 = vpop.xlane.xlu0 %1218 }
 0x38c   : > { %v3184_v13 = vpop.xlane.xlu1 %1227  ;;  %v3186_v37 = vpop.xlane.xlu0 %1224 }
 0x390   : > { %v1266_v41 = vpop.xlane.xlu1 %1265  ;;  %v1263_v14 = vpop.xlane.xlu0 %1262 }
 0x391   : > { %v1326_v47 = vmul.f32 0.00390625, %v1266_v41  ;;  %v1325_v16 = vmul.f32 0.00390625, %v1263_v14  ;;  %v1346_v14 = vmul.f32 %v3210_v15, %v3210_v15 }
 0x393   : > { %v1358_v28 = vsub.f32 %v1326_v47, %v1342_v4  ;;  %v1357_v41 = vsub.f32 %v1325_v16, %v1341_v46  ;;  %v3246_v4 = vmul.f32 0.00390625, %v1210_v45  ;;  %v1348_v46 = vmul.f32 %v3230_v56, %v3230_v56 }
 0x394   : > { %v1272_v21 = vpop.xlane.xlu1 %1271  ;;  %v1269_v19 = vpop.xlane.xlu0 %1268 }
 0x395   : > { %v1406_v20 = vadd.f32 1e-05, %v1358_v28  ;;  %v1405_v32 = vadd.f32 1e-05, %v1357_v41  ;;  %v1328_v47 = vmul.f32 0.00390625, %v1272_v21  ;;  %v1327_v16 = vmul.f32 0.00390625, %v1269_v19 }
 0x397   : > { %2022 = vrsqrt.f32 %v1406_v20  ;;  %v1360_v17 = vsub.f32 %v1328_v47, %v1344_v18  ;;  %v1359_v28 = vsub.f32 %v1327_v16, %v1343_v2  ;;  %v3265_v2 = vmul.f32 0.00390625, %v3164_v7 }
 0x398   : > { %2024 = vrsqrt.f32 %v1405_v32  ;;  %v1278_v45 = vpop.xlane.xlu1 %1277  ;;  %v1275_v21 = vpop.xlane.xlu0 %1274  ;;  %v1347_v32 = vmul.f32 %v3242_v57, %v3242_v57  ;;  %v3270_v47 = vmul.f32 0.00390625, %v3166_v33 }
 0x399   : > { %v1408_v51 = vadd.f32 1e-05, %v1360_v17  ;;  %v1407_v30 = vadd.f32 1e-05, %v1359_v28  ;;  %v1330_v42 = vmul.f32 0.00390625, %v1278_v45  ;;  %v1329_v60 = vmul.f32 0.00390625, %v1275_v21 }
 0x39a   : > { %v3273_v28 = vmul.f32 0.00390625, %v3168_v25  ;;  %v3276_v45 = vmul.f32 0.00390625, %v3170_v24  ;;  %v3279_v21 = vmul.f32 0.00390625, %v3172_v5  ;;  %v1349_v25 = vmul.f32 %v3265_v2, %v3265_v2 }
 0x39b   : > { %2026 = vrsqrt.f32 %v1408_v51  ;;  %v1362_v17 = vsub.f32 %v1330_v42, %v1346_v14  ;;  %v1361_v16 = vsub.f32 %v1329_v60, %v1345_v9  ;;  %v3282_v51 = vmul.f32 0.00390625, %v3184_v13 }
 0x39c   : > { %3654 = vst [vmem:[#allocation29_spill] sm:$0xff] %v3276_v45  ;;  %3655 = vst [vmem:[#allocation30_spill] sm:$0xff] %v3279_v21  ;;  %2028 = vrsqrt.f32 %v1407_v30  ;;  %v1284_v7 = vpop.xlane.xlu1 %1283  ;;  %v1281_v18 = vpop.xlane.xlu0 %1280  ;;  %v3285_v60 = vmul.f32 0.00390625, %v3186_v37  ;;  %v1350_v42 = vmul.f32 %v3246_v4, %v3246_v4  ;;  %v3293_v5 = vmul.f32 %v3270_v47, %v3270_v47 }
 0x39d   : > { %v1410_v20 = vadd.f32 1e-05, %v1362_v17  ;;  %v1409_v41 = vadd.f32 1e-05, %v1361_v16  ;;  %v1332_v19 = vmul.f32 0.00390625, %v1284_v7  ;;  %v1331_v33 = vmul.f32 0.00390625, %v1281_v18 }
 0x39e   : > { %3656 = vst [vmem:[#allocation31_spill] sm:$0xff] %v3282_v51  ;;  %3657 = vst [vmem:[#allocation32_spill] sm:$0xff] %v3285_v60  ;;  %v3297_v37 = vmul.f32 %v3273_v28, %v3273_v28  ;;  %v3301_v14 = vmul.f32 %v3276_v45, %v3276_v45  ;;  %v3658_v16 = vsub.f32 %v2967_v43, %v3190_v12 }
 0x39f   : > { %2030 = vrsqrt.f32 %v1410_v20  ;;  %v1364_v30 = vsub.f32 %v1332_v19, %v1348_v46  ;;  %v1363_v24 = vsub.f32 %v1331_v33, %v1347_v32  ;;  %v3305_v20 = vmul.f32 %v3279_v21, %v3279_v21 }
 0x3a0   : > { %2032 = vrsqrt.f32 %v1409_v41  ;;  %v1290_v9 = vpop.xlane.xlu1 %1289  ;;  %v1287_v13 = vpop.xlane.xlu0 %1286  ;;  %v3659_v33 = vsub.f32 %v2970_v36, %v3190_v12  ;;  %v3315_v45 = vmul.f32 %v3282_v51, %v3282_v51  ;;  %v3319_v21 = vmul.f32 %v3285_v60, %v3285_v60 }
 0x3a1   : > { %v2023_v46 = vpop.eup %2022  ;;  %v1412_v19 = vadd.f32 1e-05, %v1364_v30  ;;  %v1411_v18 = vadd.f32 1e-05, %v1363_v24  ;;  %v1334_v32 = vmul.f32 0.00390625, %v1290_v9  ;;  %v1333_v17 = vmul.f32 0.00390625, %v1287_v13 }
 0x3a2   : > { %v2025_v41 = vpop.eup %2024  ;;  %v1439_v7 = vmul.f32 %v2023_v46, %v3658_v16  ;;  %v1440_v31 = vmul.f32 %v2023_v46, %v3659_v33  ;;  %v3660_v30 = vsub.f32 %v2955_v0, %v3176_v22  ;;  %v3661_v43 = vsub.f32 %v2958_v1, %v3176_v22 }
 0x3a3   : > { %2034 = vrsqrt.f32 %v1412_v19  ;;  %v1366_v13 = vsub.f32 %v1334_v32, %v1350_v42  ;;  %v1365_v46 = vsub.f32 %v1333_v17, %v1349_v25  ;;  %v3662_v25 = vsub.f32 %v2961_v6, %v3188_v40 }
 0x3a4   : > { %v1437_v24 = vmul.f32 %v2025_v41, %v3660_v30  ;;  %v1438_v9 = vmul.f32 %v2025_v41, %v3661_v43  ;;  %v1483_v36 = vmul.f32 %v3193_v54, %v1439_v7  ;;  %v1484_v12 = vmul.f32 %v3196_v10, %v1440_v31  ;;  %v1296_v16 = vpop.xlane.xlu1 %1295  ;;  %v1293_v1 = vpop.xlane.xlu0 %1292 }
 0x3a5   : > { %2036 = vrsqrt.f32 %v1411_v18  ;;  %v2027_v33 = vpop.eup %2026  ;;  %v1414_v30 = vadd.f32 1e-05, %v1366_v13  ;;  %v1336_v51 = vmul.f32 0.00390625, %v1296_v16  ;;  %v3663_v18 = vsub.f32 %v2964_v27, %v3188_v40 }
 0x3a6   : > { %v1481_v60 = vmul.f32 %v3193_v54, %v1437_v24  ;;  %v1482_v0 = vmul.f32 %v3196_v10, %v1438_v9  ;;  %v2029_v22 = vpop.eup %2028  ;;  %v1527_v42 = vadd.f32 %v3199_v3, %v1483_v36  ;;  %v1528_v31 = vadd.f32 %v3202_v61, %v1484_v12 }
 0x3a7   : > { %v1443_v19 = vmul.f32 %v2027_v33, %v3662_v25  ;;  %v1444_v32 = vmul.f32 %v2027_v33, %v3663_v18  ;;  %v3664_v7 = vsub.f32 %v2949_v62, %v3174_v23  ;;  %v3665_v43 = vsub.f32 %v2952_v63, %v3174_v23 }
 0x3a8   : > { %v1525_v17 = vadd.f32 %v3199_v3, %v1481_v60  ;;  %v1526_v41 = vadd.f32 %v3202_v61, %v1482_v0  ;;  %1559 = vst [vmem:[%s2624_s29 + $0x10] sm:$0xff] %v1527_v42  ;;  %1560 = vst [vmem:[%s2624_s29 + $0x18] sm:$0xff] %v1528_v31  ;;  %2038 = vrsqrt.f32 %v1414_v30  ;;  %v1413_v27 = vadd.f32 1e-05, %v1365_v46  ;;  %v1302_v36 = vpop.xlane.xlu1 %1301 }
 0x3a9   : > { %v1441_v24 = vmul.f32 %v2029_v22, %v3664_v7  ;;  %v1442_v9 = vmul.f32 %v2029_v22, %v3665_v43  ;;  %v1487_v6 = vmul.f32 %v3193_v54, %v1443_v19  ;;  %v1488_v13 = vmul.f32 %v3196_v10, %v1444_v32  ;;  %v2031_v40 = vpop.eup %2030  ;;  %v1299_v19 = vpop.xlane.xlu0 %1298 }
 0x3aa   : > { %1557 = vst [vmem:[%s2624_s29] sm:$0xff] %v1525_v17  ;;  %1558 = vst [vmem:[%s2624_s29 + $0x8] sm:$0xff] %v1526_v41  ;;  %v1368_v63 = vsub.f32 %v1336_v51, %v3293_v5  ;;  %v1335_v23 = vmul.f32 0.00390625, %v1293_v1  ;;  %v2033_v12 = vpop.eup %2032  ;;  %v3666_v46 = vsub.f32 %v2985_v38, %v3210_v15  ;;  %v3667_v30 = vsub.f32 %v2988_v39, %v3210_v15 }
 0x3ab   : > { %v1485_v60 = vmul.f32 %v3193_v54, %v1441_v24  ;;  %v1486_v62 = vmul.f32 %v3196_v10, %v1442_v9  ;;  %v1531_v16 = vadd.f32 %v3199_v3, %v1487_v6  ;;  %v1532_v33 = vadd.f32 %v3202_v61, %v1488_v13 }
 0x3ac   : > { %v1447_v0 = vmul.f32 %v2031_v40, %v3666_v46  ;;  %v1448_v22 = vmul.f32 %v2031_v40, %v3667_v30  ;;  %v3668_v5 = vsub.f32 %v2992_v49, %v3214_v59  ;;  %v3669_v31 = vsub.f32 %v2995_v50, %v3214_v59 }
 0x3ad   : > { %v1529_v42 = vadd.f32 %v3199_v3, %v1485_v60  ;;  %v1530_v51 = vadd.f32 %v3202_v61, %v1486_v62  ;;  %1563 = vst [vmem:[%s2624_s29 + $0x30] sm:$0xff] %v1531_v16  ;;  %1564 = vst [vmem:[%s2624_s29 + $0x38] sm:$0xff] %v1532_v33  ;;  %2040 = vrsqrt.f32 %v1413_v27  ;;  %v1416_v15 = vadd.f32 1e-05, %v1368_v63  ;;  %v2035_v18 = vpop.eup %2034  ;;  %v1308_v63 = vpop.xlane.xlu1 %1307 }
 0x3ae   : > { %v1445_v1 = vmul.f32 %v2033_v12, %v3668_v5  ;;  %v1446_v25 = vmul.f32 %v2033_v12, %v3669_v31  ;;  %v1491_v38 = vmul.f32 %v3193_v54, %v1447_v0  ;;  %v1492_v39 = vmul.f32 %v3196_v10, %v1448_v22 }
 0x3af   : > { %1561 = vst [vmem:[%s2624_s29 + $0x20] sm:$0xff] %v1529_v42  ;;  %1562 = vst [vmem:[%s2624_s29 + $0x28] sm:$0xff] %v1530_v51  ;;  %v1367_v50 = vsub.f32 %v1335_v23, %v3297_v37  ;;  %v1338_v59 = vmul.f32 0.00390625, %v1302_v36  ;;  %v2037_v17 = vpop.eup %2036  ;;  %v3670_v24 = vsub.f32 %v3006_v58, %v3230_v56  ;;  %v3671_v9 = vsub.f32 %v3009_v53, %v3230_v56  ;;  %v1305_v36 = vpop.xlane.xlu0 %1304 }
 0x3b0   : > { %v1489_v49 = vmul.f32 %v3193_v54, %v1445_v1  ;;  %v1490_v32 = vmul.f32 %v3196_v10, %v1446_v25  ;;  %v1535_v41 = vadd.f32 %v3199_v3, %v1491_v38  ;;  %v1536_v7 = vadd.f32 %v3202_v61, %v1492_v39 }
 0x3b1   : > { %v1451_v43 = vmul.f32 %v2035_v18, %v3670_v24  ;;  %v1452_v6 = vmul.f32 %v2035_v18, %v3671_v9  ;;  %v3672_v27 = vsub.f32 %v3013_v29, %v3242_v57  ;;  %v3673_v60 = vsub.f32 %v3016_v26, %v3242_v57 }
 0x3b2   : > { %v1533_v13 = vadd.f32 %v3199_v3, %v1489_v49  ;;  %v1534_v37 = vadd.f32 %v3202_v61, %v1490_v32  ;;  %1567 = vst [vmem:[%s2624_s29 + $0x50] sm:$0xff] %v1535_v41  ;;  %1568 = vst [vmem:[%s2624_s29 + $0x58] sm:$0xff] %v1536_v7  ;;  %2042 = vrsqrt.f32 %v1416_v15  ;;  %v1415_v56 = vadd.f32 1e-05, %v1367_v50  ;;  %v2039_v12 = vpop.eup %2038 }
 0x3b3   : > { %v1449_v40 = vmul.f32 %v2037_v17, %v3672_v27  ;;  %v1450_v62 = vmul.f32 %v2037_v17, %v3673_v60  ;;  %v1495_v58 = vmul.f32 %v3193_v54, %v1451_v43  ;;  %v1496_v53 = vmul.f32 %v3196_v10, %v1452_v6 }
 0x3b4   : > { %1565 = vst [vmem:[%s2624_s29 + $0x40] sm:$0xff] %v1533_v13  ;;  %1566 = vst [vmem:[%s2624_s29 + $0x48] sm:$0xff] %v1534_v37  ;;  %v1370_v26 = vsub.f32 %v1338_v59, %v3301_v14  ;;  %v1337_v57 = vmul.f32 0.00390625, %v1299_v19  ;;  %2044 = vrsqrt.f32 %v1415_v56  ;;  %v1340_v46 = vmul.f32 0.00390625, %v1308_v63  ;;  %v3676_v13 = vld [vmem:[#allocation29_spill] sm:$0xff]  ;;  %v3678_v37 = vld [vmem:[#allocation22_spill] sm:$0xff] }
 0x3b5   : > { %v1493_v29 = vmul.f32 %v3193_v54, %v1449_v40  ;;  %v1494_v23 = vmul.f32 %v3196_v10, %v1450_v62  ;;  %v1539_v16 = vadd.f32 %v3199_v3, %v1495_v58  ;;  %v1540_v33 = vadd.f32 %v3202_v61, %v1496_v53  ;;  %v3679_v53 = vld [vmem:[#allocation30_spill] sm:$0xff]  ;;  %v3680_v56 = vld [vmem:[#allocation23_spill] sm:$0xff] }
 0x3b6   : > { %v3674_v22 = vsub.f32 %v3021_v8, %v3246_v4  ;;  %v3675_v14 = vsub.f32 %v3028_v34, %v3246_v4  ;;  %v1418_v5 = vadd.f32 1e-05, %v1370_v26  ;;  %v1369_v1 = vsub.f32 %v1337_v57, %v3305_v20 }
 0x3b7   : > { %v1537_v0 = vadd.f32 %v3199_v3, %v1493_v29  ;;  %v1538_v30 = vadd.f32 %v3202_v61, %v1494_v23  ;;  %1571 = vst [vmem:[%s2624_s29 + $0x70] sm:$0xff] %v1539_v16  ;;  %1572 = vst [vmem:[%s2624_s29 + $0x78] sm:$0xff] %v1540_v33  ;;  %v1372_v31 = vsub.f32 %v1340_v46, %v3315_v45  ;;  %v1339_v25 = vmul.f32 0.00390625, %v1305_v36  ;;  %v2041_v4 = vpop.eup %2040  ;;  %v3681_v23 = vld [vmem:[#allocation24_spill] sm:$0xff]  ;;  %v3682_v46 = vld [vmem:[#allocation31_spill] sm:$0xff] }
 0x3b8   : > { %v1455_v42 = vmul.f32 %v2039_v12, %v3674_v22  ;;  %v1456_v51 = vmul.f32 %v2039_v12, %v3675_v14  ;;  %v1389_v19 = vsub.f32 %v3035_v48, %v3265_v2  ;;  %v1390_v38 = vsub.f32 %v3038_v35, %v3265_v2  ;;  %v3684_v22 = vld [vmem:[#allocation26_spill] sm:$0xff] }
 0x3b9   : > { %1569 = vst [vmem:[%s2624_s29 + $0x60] sm:$0xff] %v1537_v0  ;;  %1570 = vst [vmem:[%s2624_s29 + $0x68] sm:$0xff] %v1538_v30  ;;  %2046 = vrsqrt.f32 %v1418_v5  ;;  %v1417_v20 = vadd.f32 1e-05, %v1369_v1  ;;  %v1420_v39 = vadd.f32 1e-05, %v1372_v31  ;;  %v1371_v45 = vsub.f32 %v1339_v25, %v3319_v21 }
 0x3ba   : > { %v1499_v8 = vmul.f32 %v3193_v54, %v1455_v42  ;;  %v1500_v34 = vmul.f32 %v3196_v10, %v1456_v51  ;;  %v1453_v18 = vmul.f32 %v2041_v4, %v1389_v19  ;;  %v1454_v35 = vmul.f32 %v2041_v4, %v1390_v38  ;;  %v3683_v0 = vld [vmem:[#allocation25_spill] sm:$0xff]  ;;  %v3685_v19 = vld [vmem:[#allocation32_spill] sm:$0xff]  ;;  %v3686_v38 = vld [vmem:[#allocation27_spill] sm:$0xff] }
 0x3bb   : > { %v1395_v2 = vsub.f32 %v3041_v44, %v3270_v47  ;;  %2048 = vrsqrt.f32 %v1417_v20  ;;  %v1419_v49 = vadd.f32 1e-05, %v1371_v45  ;;  %v1396_v32 = vsub.f32 %v3044_v52, %v3270_v47 }
 0x3bc   : > { %v1543_v15 = vadd.f32 %v3199_v3, %v1499_v8  ;;  %v1544_v48 = vadd.f32 %v3202_v61, %v1500_v34  ;;  %v1497_v21 = vmul.f32 %v3193_v54, %v1453_v18  ;;  %v1498_v50 = vmul.f32 %v3196_v10, %v1454_v35  ;;  %v2043_v59 = vpop.eup %2042  ;;  %v3687_v34 = vld [vmem:[#allocation28_spill] sm:$0xff] }
 0x3bd   : > { %2050 = vrsqrt.f32 %v1420_v39  ;;  %v1393_v17 = vsub.f32 %v3048_v55, %v3273_v28  ;;  %v1394_v44 = vsub.f32 %v3051_v11, %v3273_v28  ;;  %v1459_v47 = vmul.f32 %v2043_v59, %v1395_v2  ;;  %v3677_v11 = vld [vmem:[#allocation21_spill] sm:$0xff] }
 0x3be   : > { %1575 = vst [vmem:[%s2624_s29 + $0x90] sm:$0xff] %v1543_v15  ;;  %1576 = vst [vmem:[%s2624_s29 + $0x98] sm:$0xff] %v1544_v48  ;;  %2052 = vrsqrt.f32 %v1419_v49  ;;  %v1541_v41 = vadd.f32 %v3199_v3, %v1497_v21  ;;  %v1542_v52 = vadd.f32 %v3202_v61, %v1498_v50  ;;  %v1460_v7 = vmul.f32 %v2043_v59, %v1396_v32  ;;  %v2045_v24 = vpop.eup %2044 }
 0x3bf   : > { %v1503_v43 = vmul.f32 %v3193_v54, %v1459_v47  ;;  %v1457_v55 = vmul.f32 %v2045_v24, %v1393_v17  ;;  %v1458_v6 = vmul.f32 %v2045_v24, %v1394_v44  ;;  %v1399_v28 = vsub.f32 %v3677_v11, %v3676_v13 }
 0x3c0   : > { %1573 = vst [vmem:[%s2624_s29 + $0x80] sm:$0xff] %v1541_v41  ;;  %1574 = vst [vmem:[%s2624_s29 + $0x88] sm:$0xff] %v1542_v52  ;;  %v1504_v9 = vmul.f32 %v3196_v10, %v1460_v7  ;;  %v1400_v27 = vsub.f32 %v3678_v37, %v3676_v13  ;;  %v1397_v29 = vsub.f32 %v3680_v56, %v3679_v53 }
 0x3c1   : > { %v1547_v40 = vadd.f32 %v3199_v3, %v1503_v43  ;;  %v1501_v62 = vmul.f32 %v3193_v54, %v1457_v55  ;;  %v1502_v63 = vmul.f32 %v3196_v10, %v1458_v6  ;;  %v1398_v26 = vsub.f32 %v3681_v23, %v3679_v53 }
 0x3c2   : > { %v1548_v60 = vadd.f32 %v3202_v61, %v1504_v9  ;;  %v1403_v30 = vsub.f32 %v3683_v0, %v3682_v46  ;;  %v1404_v42 = vsub.f32 %v3684_v22, %v3682_v46  ;;  %v1401_v8 = vsub.f32 %v3686_v38, %v3685_v19 }
 0x3c3   : > { %v2047_v58 = vpop.eup %2046  ;;  %1579 = vst [vmem:[%s2624_s29 + $0xb0] sm:$0xff] %v1547_v40  ;;  %v1545_v57 = vadd.f32 %v3199_v3, %v1501_v62  ;;  %v1546_v36 = vadd.f32 %v3202_v61, %v1502_v63  ;;  %v1402_v4 = vsub.f32 %v3687_v34, %v3685_v19 }
 0x3c4   : > { %1580 = vst [vmem:[%s2624_s29 + $0xb8] sm:$0xff] %v1548_v60  ;;  %v1463_v12 = vmul.f32 %v2047_v58, %v1399_v28  ;;  %v1464_v16 = vmul.f32 %v2047_v58, %v1400_v27 }
 0x3c5   : > { %v2049_v33 = vpop.eup %2048  ;;  %1577 = vst [vmem:[%s2624_s29 + $0xa0] sm:$0xff] %v1545_v57  ;;  %1578 = vst [vmem:[%s2624_s29 + $0xa8] sm:$0xff] %v1546_v36 }
 0x3c6   : > { %v1507_v51 = vmul.f32 %v3193_v54, %v1463_v12  ;;  %v1508_v5 = vmul.f32 %v3196_v10, %v1464_v16  ;;  %v1461_v1 = vmul.f32 %v2049_v33, %v1397_v29  ;;  %v1462_v31 = vmul.f32 %v2049_v33, %v1398_v26 }
 0x3c7   : > { %v2051_v14 = vpop.eup %2050 }
 0x3c8   : > { %v2053_v25 = vpop.eup %2052  ;;  %v1467_v20 = vmul.f32 %v2051_v14, %v1403_v30  ;;  %v1468_v39 = vmul.f32 %v2051_v14, %v1404_v42  ;;  %v1551_v45 = vadd.f32 %v3199_v3, %v1507_v51  ;;  %v1552_v15 = vadd.f32 %v3202_v61, %v1508_v5 }
 0x3c9   : > { %v1505_v48 = vmul.f32 %v3193_v54, %v1461_v1  ;;  %v1506_v18 = vmul.f32 %v3196_v10, %v1462_v31  ;;  %v1465_v49 = vmul.f32 %v2053_v25, %v1401_v8  ;;  %v1466_v32 = vmul.f32 %v2053_v25, %v1402_v4 }
 0x3ca   : > { %v1511_v35 = vmul.f32 %v3193_v54, %v1467_v20  ;;  %v1512_v2 = vmul.f32 %v3196_v10, %v1468_v39  ;;  %1583 = vst [vmem:[%s2624_s29 + $0xd0] sm:$0xff] %v1551_v45  ;;  %1584 = vst [vmem:[%s2624_s29 + $0xd8] sm:$0xff] %v1552_v15 }
 0x3cb   : > { %v1549_v21 = vadd.f32 %v3199_v3, %v1505_v48  ;;  %v1550_v50 = vadd.f32 %v3202_v61, %v1506_v18  ;;  %v1509_v44 = vmul.f32 %v3193_v54, %v1465_v49  ;;  %v1510_v41 = vmul.f32 %v3196_v10, %v1466_v32 }
 0x3cc   : > { %v1555_v59 = vadd.f32 %v3199_v3, %v1511_v35  ;;  %v1556_v17 = vadd.f32 %v3202_v61, %v1512_v2 }
 0x3cd   : > { %1581 = vst [vmem:[%s2624_s29 + $0xc0] sm:$0xff] %v1549_v21  ;;  %1582 = vst [vmem:[%s2624_s29 + $0xc8] sm:$0xff] %v1550_v50  ;;  %v1553_v52 = vadd.f32 %v3199_v3, %v1509_v44  ;;  %v1554_v47 = vadd.f32 %v3202_v61, %v1510_v41 }
 0x3ce   : > { %1587 = vst [vmem:[%s2624_s29 + $0xf0] sm:$0xff] %v1555_v59  ;;  %1588 = vst [vmem:[%s2624_s29 + $0xf8] sm:$0xff] %v1556_v17 }
 0x3cf   : > { %1585 = vst [vmem:[%s2624_s29 + $0xe0] sm:$0xff] %v1553_v52  ;;  %1586 = vst [vmem:[%s2624_s29 + $0xe8] sm:$0xff] %v1554_v47 }
 0x3d0 PF: > { %s3688_s16 = sld [smem:[#allocation15_spill]]  ;;  %s1604_s12 = sshll.u32 %s2624_s29, 4  ;;  %s3506_s12 = int_to_ptr.vmem [resolvable:$true] %s1604_s12 }
 0x3d1   : > { %s3689_s13 = sld [smem:[#allocation37_spill]]  ;;  %s1590_s18 = scalar_lea.sflag [#allocation5], %s2597_s1 }
 0x3d2   : > { %s2144_s23 = scalar_lea.vmem %s3506_s12, 4096  ;;  %p3690_p11 = scmp.ne.s32.totalorder %s3631_s21, 0 }
 0x3d3   : > { %p2145_p13 = scmp.ne.s32.totalorder %s3506_s12, %s2144_s23  ;;  %s2279_s5 = smov [#allocation9]  }
 0x3d4   : > { %s2148_s26 = sshll.u32 %s2279_s5, 4  ;;  %s2149_s26 = int_to_ptr.vmem [resolvable:$false] %s2148_s26 }
 0x3d5   : > { %p2146_p6 = pnand %p2145_p13, %p3690_p11  ;;  %s2150_s24 = scalar_lea.vmem %s2149_s26, 8192 }
 0x3d6   : > { %s1775_s8 = sshll.u32 %s3688_s16, 12  ;;  %p2151_p1 = scmp.lt.s32.totalorder %s3506_s12, %s2149_s26 }
 0x3d7   : > { %s3503_s20 = scalar_lea.hbm %s3689_s13, %s1775_s8  ;;  %p2147_p5 = pneg %p2146_p6 }
 0x3d8   : > { %p2152_p0 = scmp.lt.s32.totalorder %s2150_s24, %s2144_s23 }
 0x3da   : > { %p2153_p9 = por %p2152_p0, %p2151_p1 }
 0x3dc   : > { %p2154_p12 = pnand %p2153_p9, %p2147_p5 }
 0x3de   : > { %2157 = shalt.err (!%p2154_p12)
}
 0x3df   : > { %s2158_s29 = scalar_lea.hbm %s3503_s20, 4096  ;;  %s2162_s10 = scalar_lea.hbm %s3689_s13, 8192 }
 0x3e0   : > { %p2159_p3 = scmp.ne.s32.totalorder %s3503_s20, %s2158_s29  ;;  %p2163_p8 = scmp.lt.u32.totalorder %s3503_s20, %s3689_s13 }
 0x3e1   : > { %p2164_p10 = scmp.lt.u32.totalorder %s2162_s10, %s2158_s29  ;;  %p2166_p13 = scmp.lt.u32.totalorder %s2158_s29, %s3503_s20 }
 0x3e2   : > { %p2160_p4 = pnand %p2159_p3, %p3690_p11 }
 0x3e3   : > { %p2165_p2 = por %p2164_p10, %p2163_p8 }
 0x3e4   : > { %p2161_p7 = pneg %p2160_p4 }
 0x3e5   : > { %p2167_p6 = por %p2166_p13, %p2165_p2 }
 0x3e7   : > { %p2168_p5 = pnand %p2167_p6, %p2161_p7 }
 0x3e9   : > { %2171 = shalt.err (!%p2168_p5)
}
 0x3ea   : > { %s2280_s14 = smov 256   ;;  %s2281_s15 = smov 16  }
 0x3eb   : > { %1910 = dma.vmem_to_hbm [thread:$0]  (%p3690_p11), %s3506_s12, 4096, %s3503_s20, %s1590_s18, %s2280_s14, %s2280_s14, %s2281_s15  }
 0x3ec PF: > { %p1927_p1 = scmp.ge.s32.totalorder %s2270_s11, 2  ;;  %s1619_s16 = sand.u32 1, %s2242_s27  }
 0x3ed   : > { %p3691_p0 = scmp.ne.s32.totalorder %s3633_s6, 0  ;;  %s1620_s8 = scalar_lea.sflag [#allocation5], %s1619_s16 }
 0x3ef   : > { %p1923_p9 = pnand %p1927_p1, %p3691_p0 }
 0x3f1   : > { %2225 = dma.done.wait (!%p1923_p9), %s1620_s8, 4096  }
 0x3f2   : > { %2227 = vsyncadd (!%p1923_p9), %s1620_s8, 4294963200  ;;  %s26_s11 = sadd.s32 1, %s2270_s11   ;;  %s3692_s4 = sld [smem:[#allocation13_spill]] }
 0x3f3   : > { %p23_p12 = scmp.ge.s32.totalorder %s26_s11, 6   ;;  %s3693_s26 = sld [smem:[#allocation18_spill]] }
 0x3f4   : > { %s3694_s21 = sld [smem:[#allocation14_spill]]  ;;  %s3695_s29 = sld [smem:[#allocation20_spill]] }
 0x3f5   : > { %s3696_s8 = sld [smem:[#allocation16_spill]]  ;;  %s3697_s1 = sld [smem:[#allocation17_spill]] }
 0x3f6   : > { %s3698_s10 = sld [smem:[#allocation19_spill]]  ;;  %s3699_s24 = smov %s2234_s25 }
 0x3f7   : > { %s3701_s27 = smov %s2246_s28  ;;  %s3703_s30 = smov %s2262_s9 }
 0x3f8   : > { %s3700_s25 = smov %s3692_s4  ;;  %25 = sbr.rel (!%p23_p12) target bundleno = 17 (0x11), region = 128 }
 0x3fa   : > { %s3702_s28 = smov %s3694_s21 }
 0x3fb   : > { %s3704_s9 = smov %s3697_s1 }
 0x3ff   :  { %1625 = vsyncpa [#allocation4], 1 }
 0x400   :  { %1627 = vsyncpa [#allocation4 + $0x1], 1 }
 0x401   :  { %1628 = vsyncpa [#allocation7], 1 }
 0x402   :  { %1630 = vsyncpa [#allocation7 + $0x1], 1 }
 0x403   :  { %1631 = vsyncpa [#allocation5], 1 }
 0x404   :  { %1633 = vsyncpa [#allocation5 + $0x1], 1 }

</bundles_post_ra>
